<compile_context>
chip_gen: v7x
topology: tpu7x:2x2x1
jax: 0.10.0
libtpu: 0.0.40
codegen_flags: <defaults>
</compile_context>

<pallas_src>
import functools

import jax
import jax.numpy as jnp
from jax.experimental import pallas as pl
from jax.experimental.pallas import tpu as pltpu

EPS = 1e-5          # nn.BatchNorm1d default eps
NEG_SLOPE = 0.01    # nn.LeakyReLU default negative_slope


def _round_up(n, m):
    return ((n + m - 1) // m) * m


def _leaky_relu(x):
    return jnp.where(x > 0, x, NEG_SLOPE * x)


# -----------------------------------------------------------------------------
# Wrapper-side parameter preparation: fold BN, fuse, pad to lane width, pack.
# -----------------------------------------------------------------------------
def _fold_bn(w, b, gamma, beta, mean, var):
    """Fold eval-mode BatchNorm1d into the preceding Linear (all in f32)."""
    scale = gamma * jax.lax.rsqrt(var + EPS)      # (1, out)
    return w * scale, (b - mean) * scale + beta


def _pad_cols(a, width):
    return jnp.pad(a, ((0, 0), (0, width - a.shape[1])))


def _pad_rows(a, height):
    return jnp.pad(a, ((0, height - a.shape[0]), (0, 0)))


def prepare_params(p, input_dim, latent_dim):
    in_p = _round_up(input_dim, 128)
    lat_p = _round_up(latent_dim, 128)

    # encoder: Linear(input,256)+BN1 ; Linear(256,latent)+BN2
    w1, b1 = _fold_bn(p["w1"], p["b1"], p["g1"], p["be1"], p["m1"], p["v1"])
    w2, b2 = _fold_bn(p["w2"], p["b2"], p["g2"], p["be2"], p["m2"], p["v2"])
    w2, b2 = _pad_cols(w2, lat_p), _pad_cols(b2, lat_p)

    # decoder layer-1 (+BN3) fused with MLP layer-1 -> (latent, 384)
    w3, b3 = _fold_bn(p["w3"], p["b3"], p["g3"], p["be3"], p["m3"], p["v3"])
    w35 = _pad_rows(jnp.concatenate([w3, p["w5"]], axis=1), lat_p)
    b35 = jnp.concatenate([b3, p["b5"]], axis=1)

    # decoder output layer, lane-dense padded
    w4, b4 = _pad_cols(p["w4"], in_p), _pad_cols(p["b4"], in_p)

    # MLP output layer (out=1), lane-dense padded
    w6, b6 = _pad_cols(p["w6"], 128), _pad_cols(p["b6"], 128)

    # single packed bias array, all segment offsets are multiples of 128
    b_all = jnp.concatenate([b1, b2, b35, b4, b6], axis=1).astype(jnp.float32)

    bf = lambda a: a.astype(jnp.bfloat16)
    return {
        "w1": bf(w1), "w2": bf(w2), "w35": bf(w35), "w4": bf(w4), "w6": bf(w6),
        "b_all": b_all,
        "input_dim": input_dim, "latent_dim": latent_dim,
        "in_p": in_p, "lat_p": lat_p,
    }


# -----------------------------------------------------------------------------
# Kernel
# -----------------------------------------------------------------------------
def _make_kernel(in_p, lat_p):
    o_b1 = 0
    o_b2 = 256
    o_b35 = o_b2 + lat_p
    o_b4 = o_b35 + 384
    o_b6 = o_b4 + in_p

    def kernel(x_ref, w1_ref, w2_ref, w35_ref, w4_ref, w6_ref, b_ref, out_ref):
        x = x_ref[...].astype(jnp.bfloat16)

        # encoder: Linear(+BN1 folded) -> LeakyReLU   (Dropout = identity, eval)
        h = jnp.dot(x, w1_ref[...], preferred_element_type=jnp.float32)
        h = _leaky_relu(h + b_ref[:, o_b1:o_b1 + 256])

        # encoder: Linear(+BN2 folded) -> LeakyReLU   (cols padded to lat_p)
        lat = jnp.dot(h.astype(jnp.bfloat16), w2_ref[...],
                      preferred_element_type=jnp.float32)
        lat = _leaky_relu(lat + b_ref[:, o_b2:o_b2 + lat_p])

        # fused: decoder Linear(+BN3 folded) || MLP Linear -> LeakyReLU
        dm = jnp.dot(lat.astype(jnp.bfloat16), w35_ref[...],
                     preferred_element_type=jnp.float32)
        dm = _leaky_relu(dm + b_ref[:, o_b35:o_b35 + 384])
        d = dm[:, :256].astype(jnp.bfloat16)     # decoder hidden
        m = dm[:, 256:384].astype(jnp.bfloat16)  # mlp hidden (Dropout = identity)

        # decoder output: Linear -> Sigmoid            (cols padded to in_p)
        r = jnp.dot(d, w4_ref[...], preferred_element_type=jnp.float32)
        r = jax.nn.sigmoid(r + b_ref[:, o_b4:o_b4 + in_p])

        # mlp output: Linear                           (cols padded to 128)
        pr = jnp.dot(m, w6_ref[...], preferred_element_type=jnp.float32)
        pr = pr + b_ref[:, o_b6:o_b6 + 128]

        # lane-dense packed output slab: [reconstruction | latent | prediction]
        out_ref[:, 0:in_p] = r
        out_ref[:, in_p:in_p + lat_p] = lat
        out_ref[:, in_p + lat_p:in_p + lat_p + 128] = pr

    return kernel


# -----------------------------------------------------------------------------
# Wrapper
# -----------------------------------------------------------------------------
def supervised_autoencoder(x, prep, *, b_tile=128):
    B, input_dim = x.shape
    assert input_dim == prep["input_dim"]
    latent_dim = prep["latent_dim"]
    in_p, lat_p = prep["in_p"], prep["lat_p"]
    out_w = in_p + lat_p + 128

    # batch tiling: pad B to a multiple of the tile (tile itself multiple of 8)
    b_tile = max(8, min(b_tile, _round_up(B, 8)))
    b_pad = _round_up(B, b_tile)
    if b_pad != B:
        x = jnp.pad(x, ((0, b_pad - B), (0, 0)))
    n_tiles = b_pad // b_tile

    w1, w2, w35, w4, w6, b_all = (prep["w1"], prep["w2"], prep["w35"],
                                  prep["w4"], prep["w6"], prep["b_all"])

    const = lambda shape: pl.BlockSpec(shape, lambda i: (0, 0))

    flops = 2 * b_pad * (input_dim * 256 + 256 * lat_p + lat_p * 384
                         + 256 * in_p + 128 * 128)
    bytes_accessed = (x.size * 4 + b_all.size * 4 + b_pad * out_w * 4
                      + 2 * (w1.size + w2.size + w35.size + w4.size + w6.size))
    cost = pl.CostEstimate(flops=flops, transcendentals=b_pad * in_p,
                           bytes_accessed=bytes_accessed)

    out = pl.pallas_call(
        _make_kernel(in_p, lat_p),
        grid=(n_tiles,),
        in_specs=[
            pl.BlockSpec((b_tile, input_dim), lambda i: (i, 0)),   # x tile
            const(w1.shape), const(w2.shape), const(w35.shape),
            const(w4.shape), const(w6.shape), const(b_all.shape),  # resident
        ],
        out_specs=pl.BlockSpec((b_tile, out_w), lambda i: (i, 0)),
        out_shape=jax.ShapeDtypeStruct((b_pad, out_w), jnp.float32),
        compiler_params=pltpu.CompilerParams(
            dimension_semantics=("parallel",),
            vmem_limit_bytes=32 * 1024 * 1024,
        ),
        cost_estimate=cost,
    )(x, w1, w2, w35, w4, w6, b_all)

    recon = out[:B, :input_dim]
    latent = out[:B, in_p:in_p + latent_dim]
    pred = out[:B, in_p + lat_p:in_p + lat_p + 1]
    return recon, pred, latent


# -----------------------------------------------------------------------------
# Deterministic init mimicking PyTorch defaults (Linear: U(+-1/sqrt(fan_in)),
# weights stored transposed (in, out)).  BN running stats randomized mildly so
# the fold path is actually exercised.
# -----------------------------------------------------------------------------
def init_raw_params(key, input_dim, latent_dim):
    def linear(k, fan_in, fan_out):
        kw, kb = jax.random.split(k)
        bound = 1.0 / jnp.sqrt(float(fan_in))
        w = jax.random.uniform(kw, (fan_in, fan_out), jnp.float32, -bound, bound)
        b = jax.random.uniform(kb, (1, fan_out), jnp.float32, -bound, bound)
        return w, b

    def bn(k, dim):
        kg, kb, km, kv = jax.random.split(k, 4)
        return (jax.random.uniform(kg, (1, dim), jnp.float32, 0.8, 1.2),   # gamma
                jax.random.uniform(kb, (1, dim), jnp.float32, -0.2, 0.2),  # beta
                jax.random.uniform(km, (1, dim), jnp.float32, -0.2, 0.2),  # mean
                jax.random.uniform(kv, (1, dim), jnp.float32, 0.8, 1.2))   # var

    keys = jax.random.split(key, 9)
    p = {}
    p["w1"], p["b1"] = linear(keys[0], input_dim, 256)
    p["g1"], p["be1"], p["m1"], p["v1"] = bn(keys[1], 256)
    p["w2"], p["b2"] = linear(keys[2], 256, latent_dim)
    p["g2"], p["be2"], p["m2"], p["v2"] = bn(keys[3], latent_dim)
    p["w3"], p["b3"] = linear(keys[4], latent_dim, 256)
    p["g3"], p["be3"], p["m3"], p["v3"] = bn(keys[5], 256)
    p["w4"], p["b4"] = linear(keys[6], 256, input_dim)
    p["w5"], p["b5"] = linear(keys[7], latent_dim, 128)
    p["w6"], p["b6"] = linear(keys[8], 128, 1)
    return p


# -----------------------------------------------------------------------------
# References
# -----------------------------------------------------------------------------
def reference_fp32(x, p):
    """Full-f32, unfolded eval-mode module semantics."""
    def bn(z, g, be, m, v):
        return (z - m) * jax.lax.rsqrt(v + EPS) * g + be
    h = _leaky_relu(bn(x @ p["w1"] + p["b1"], p["g1"], p["be1"], p["m1"], p["v1"]))
    lat = _leaky_relu(bn(h @ p["w2"] + p["b2"], p["g2"], p["be2"], p["m2"], p["v2"]))
    d = _leaky_relu(bn(lat @ p["w3"] + p["b3"], p["g3"], p["be3"], p["m3"], p["v3"]))
    recon = jax.nn.sigmoid(d @ p["w4"] + p["b4"])
    m = _leaky_relu(lat @ p["w5"] + p["b5"])
    pred = m @ p["w6"] + p["b6"]
    return recon, pred, lat


def reference_bf16(x, prep):
    """Pure-JAX mirror of the exact kernel math (folded BN + bf16 matmuls)."""
    input_dim, latent_dim = prep["input_dim"], prep["latent_dim"]
    in_p, lat_p = prep["in_p"], prep["lat_p"]
    b = prep["b_all"]
    o2, o35 = 256, 256 + lat_p
    o4, o6 = 256 + lat_p + 384, 256 + lat_p + 384 + in_p
    dot = functools.partial(jnp.dot, preferred_element_type=jnp.float32)
    bf = jnp.bfloat16
    h = _leaky_relu(dot(x.astype(bf), prep["w1"]) + b[:, 0:256])
    lat = _leaky_relu(dot(h.astype(bf), prep["w2"]) + b[:, o2:o2 + lat_p])
    dm = _leaky_relu(dot(lat.astype(bf), prep["w35"]) + b[:, o35:o35 + 384])
    recon = jax.nn.sigmoid(dot(dm[:, :256].astype(bf), prep["w4"]) + b[:, o4:o4 + in_p])
    pred = dot(dm[:, 256:384].astype(bf), prep["w6"]) + b[:, o6:o6 + 128]
    return recon[:, :input_dim], pred[:, :1], lat[:, :latent_dim]


if __name__ == "__main__":
    key = jax.random.PRNGKey(0)
    kx, kp = jax.random.split(key)

    batch, input_dim, latent_dim = 256, 32, 16
    x = jax.random.uniform(kx, (batch, input_dim), jnp.float32)
    raw = init_raw_params(kp, input_dim, latent_dim)
    prep = prepare_params(raw, input_dim, latent_dim)

    recon, pred, latent = supervised_autoencoder(x, prep, b_tile=128)
    jax.block_until_ready((recon, pred, latent))

    assert recon.shape == (batch, input_dim)
    assert pred.shape == (batch, 1)
    assert latent.shape == (batch, latent_dim)

    # tight check: kernel vs pure-JAX mirror of the same folded/bf16 math
    r_bf, p_bf, l_bf = reference_bf16(x, prep)
    assert jnp.allclose(recon, r_bf, rtol=1e-3, atol=1e-3)
    assert jnp.allclose(pred, p_bf, rtol=1e-3, atol=1e-3)
    assert jnp.allclose(latent, l_bf, rtol=1e-3, atol=1e-3)

    # semantics check: kernel vs full-f32 eval-mode module reference
    r32, p32, l32 = reference_fp32(x, raw)
    assert jnp.allclose(recon, r32, rtol=5e-2, atol=5e-2)
    assert jnp.allclose(pred, p32, rtol=5e-2, atol=5e-2)
    assert jnp.allclose(latent, l32, rtol=5e-2, atol=5e-2)

    print("KERNEL_OK")
</pallas_src>

<mosaic_0001>
module attributes {stable_mosaic.version = 11 : i64} {
  func.func @kernel(%arg0: i32, %arg1: memref<128x32xf32, #tpu.memory_space<vmem>>, %arg2: memref<32x256xbf16, #tpu.memory_space<vmem>>, %arg3: memref<256x128xbf16, #tpu.memory_space<vmem>>, %arg4: memref<128x384xbf16, #tpu.memory_space<vmem>>, %arg5: memref<256x128xbf16, #tpu.memory_space<vmem>>, %arg6: memref<128x128xbf16, #tpu.memory_space<vmem>>, %arg7: memref<1x1024xf32, #tpu.memory_space<vmem>>, %arg8: memref<128x384xf32, #tpu.memory_space<vmem>>) attributes {dimension_semantics = [#tpu.dimension_semantics<parallel>], iteration_bounds = array<i64: 2>, scalar_prefetch = 0 : i64, scratch_operands = 0 : i64, tpu.core_type = #tpu.core_type<tc>, window_params = [{transform_indices = @transform_0, window_bounds = array<i64: 128, 32>}, {pipeline_mode = #tpu.pipeline_mode<synchronous>, transform_indices = @transform_1, window_bounds = array<i64: 32, 256>}, {pipeline_mode = #tpu.pipeline_mode<synchronous>, transform_indices = @transform_2, window_bounds = array<i64: 256, 128>}, {pipeline_mode = #tpu.pipeline_mode<synchronous>, transform_indices = @transform_3, window_bounds = array<i64: 128, 384>}, {pipeline_mode = #tpu.pipeline_mode<synchronous>, transform_indices = @transform_4, window_bounds = array<i64: 256, 128>}, {pipeline_mode = #tpu.pipeline_mode<synchronous>, transform_indices = @transform_5, window_bounds = array<i64: 128, 128>}, {pipeline_mode = #tpu.pipeline_mode<synchronous>, transform_indices = @transform_6, window_bounds = array<i64: 1, 1024>}, {transform_indices = @transform_7, window_bounds = array<i64: 128, 384>}]} {
    %c0 = arith.constant 0 : index
    %c0_0 = arith.constant 0 : index
    %0 = vector.load %arg1[%c0, %c0_0] : memref<128x32xf32, #tpu.memory_space<vmem>>, vector<128x32xf32>
    %1 = arith.truncf %0 : vector<128x32xf32> to vector<128x32xbf16>
    %c0_1 = arith.constant 0 : index
    %c0_2 = arith.constant 0 : index
    %2 = vector.load %arg2[%c0_1, %c0_2] : memref<32x256xbf16, #tpu.memory_space<vmem>>, vector<32x256xbf16>
    %cst = arith.constant dense<0.000000e+00> : vector<128x256xf32>
    %3 = tpu.matmul %1, %2, %cst {dimension_numbers = #tpu.dot_dimension_numbers<[1], [0], [0], [1], [0, 0, 1, 1], [], []>} : vector<128x32xbf16>, vector<32x256xbf16>, vector<128x256xf32> -> vector<128x256xf32>
    %c0_3 = arith.constant 0 : index
    %c0_4 = arith.constant 0 : index
    %4 = vector.load %arg7[%c0_3, %c0_4] : memref<1x1024xf32, #tpu.memory_space<vmem>>, vector<1x256xf32>
    %5 = vector.broadcast %4 : vector<1x256xf32> to vector<128x256xf32>
    %6 = arith.addf %3, %5 : vector<128x256xf32>
    %cst_5 = arith.constant 0.000000e+00 : f32
    %7 = vector.broadcast %cst_5 : f32 to vector<128x256xf32>
    %8 = arith.cmpf ogt, %6, %7 : vector<128x256xf32>
    %cst_6 = arith.constant 0.00999999977 : f32
    %9 = vector.broadcast %cst_6 : f32 to vector<128x256xf32>
    %10 = arith.mulf %9, %6 : vector<128x256xf32>
    %11 = arith.select %8, %6, %10 : vector<128x256xi1>, vector<128x256xf32>
    %12 = arith.truncf %11 : vector<128x256xf32> to vector<128x256xbf16>
    %c0_7 = arith.constant 0 : index
    %c0_8 = arith.constant 0 : index
    %13 = vector.load %arg3[%c0_7, %c0_8] : memref<256x128xbf16, #tpu.memory_space<vmem>>, vector<256x128xbf16>
    %cst_9 = arith.constant dense<0.000000e+00> : vector<128x128xf32>
    %14 = tpu.matmul %12, %13, %cst_9 {dimension_numbers = #tpu.dot_dimension_numbers<[1], [0], [0], [1], [0, 0, 1, 1], [], []>} : vector<128x256xbf16>, vector<256x128xbf16>, vector<128x128xf32> -> vector<128x128xf32>
    %c0_10 = arith.constant 0 : index
    %c256 = arith.constant 256 : index
    %15 = vector.load %arg7[%c0_10, %c256] : memref<1x1024xf32, #tpu.memory_space<vmem>>, vector<1x128xf32>
    %16 = vector.broadcast %15 : vector<1x128xf32> to vector<128x128xf32>
    %17 = arith.addf %14, %16 : vector<128x128xf32>
    %cst_11 = arith.constant 0.000000e+00 : f32
    %18 = vector.broadcast %cst_11 : f32 to vector<128x128xf32>
    %19 = arith.cmpf ogt, %17, %18 : vector<128x128xf32>
    %cst_12 = arith.constant 0.00999999977 : f32
    %20 = vector.broadcast %cst_12 : f32 to vector<128x128xf32>
    %21 = arith.mulf %20, %17 : vector<128x128xf32>
    %22 = arith.select %19, %17, %21 : vector<128x128xi1>, vector<128x128xf32>
    %23 = arith.truncf %22 : vector<128x128xf32> to vector<128x128xbf16>
    %c0_13 = arith.constant 0 : index
    %c0_14 = arith.constant 0 : index
    %24 = vector.load %arg4[%c0_13, %c0_14] : memref<128x384xbf16, #tpu.memory_space<vmem>>, vector<128x384xbf16>
    %cst_15 = arith.constant dense<0.000000e+00> : vector<128x384xf32>
    %25 = tpu.matmul %23, %24, %cst_15 {dimension_numbers = #tpu.dot_dimension_numbers<[1], [0], [0], [1], [0, 0, 1, 1], [], []>} : vector<128x128xbf16>, vector<128x384xbf16>, vector<128x384xf32> -> vector<128x384xf32>
    %c0_16 = arith.constant 0 : index
    %c384 = arith.constant 384 : index
    %26 = vector.load %arg7[%c0_16, %c384] : memref<1x1024xf32, #tpu.memory_space<vmem>>, vector<1x384xf32>
    %27 = vector.broadcast %26 : vector<1x384xf32> to vector<128x384xf32>
    %28 = arith.addf %25, %27 : vector<128x384xf32>
    %cst_17 = arith.constant 0.000000e+00 : f32
    %29 = vector.broadcast %cst_17 : f32 to vector<128x384xf32>
    %30 = arith.cmpf ogt, %28, %29 : vector<128x384xf32>
    %cst_18 = arith.constant 0.00999999977 : f32
    %31 = vector.broadcast %cst_18 : f32 to vector<128x384xf32>
    %32 = arith.mulf %31, %28 : vector<128x384xf32>
    %33 = arith.select %30, %28, %32 : vector<128x384xi1>, vector<128x384xf32>
    %34 = vector.extract_strided_slice %33 {offsets = [0, 0], sizes = [128, 256], strides = [1, 1]} : vector<128x384xf32> to vector<128x256xf32>
    %35 = arith.truncf %34 : vector<128x256xf32> to vector<128x256xbf16>
    %36 = vector.extract_strided_slice %33 {offsets = [0, 256], sizes = [128, 128], strides = [1, 1]} : vector<128x384xf32> to vector<128x128xf32>
    %37 = arith.truncf %36 : vector<128x128xf32> to vector<128x128xbf16>
    %c0_19 = arith.constant 0 : index
    %c0_20 = arith.constant 0 : index
    %38 = vector.load %arg5[%c0_19, %c0_20] : memref<256x128xbf16, #tpu.memory_space<vmem>>, vector<256x128xbf16>
    %cst_21 = arith.constant dense<0.000000e+00> : vector<128x128xf32>
    %39 = tpu.matmul %35, %38, %cst_21 {dimension_numbers = #tpu.dot_dimension_numbers<[1], [0], [0], [1], [0, 0, 1, 1], [], []>} : vector<128x256xbf16>, vector<256x128xbf16>, vector<128x128xf32> -> vector<128x128xf32>
    %c0_22 = arith.constant 0 : index
    %c768 = arith.constant 768 : index
    %40 = vector.load %arg7[%c0_22, %c768] : memref<1x1024xf32, #tpu.memory_space<vmem>>, vector<1x128xf32>
    %41 = vector.broadcast %40 : vector<1x128xf32> to vector<128x128xf32>
    %42 = arith.addf %39, %41 : vector<128x128xf32>
    %43 = arith.negf %42 : vector<128x128xf32>
    %44 = math.exp %43 : vector<128x128xf32>
    %cst_23 = arith.constant 1.000000e+00 : f32
    %45 = vector.broadcast %cst_23 : f32 to vector<128x128xf32>
    %46 = arith.addf %45, %44 : vector<128x128xf32>
    %47 = arith.divf %45, %46 : vector<128x128xf32>
    %c0_24 = arith.constant 0 : index
    %c0_25 = arith.constant 0 : index
    %48 = vector.load %arg6[%c0_24, %c0_25] : memref<128x128xbf16, #tpu.memory_space<vmem>>, vector<128x128xbf16>
    %cst_26 = arith.constant dense<0.000000e+00> : vector<128x128xf32>
    %49 = tpu.matmul %37, %48, %cst_26 {dimension_numbers = #tpu.dot_dimension_numbers<[1], [0], [0], [1], [0, 0, 1, 1], [], []>} : vector<128x128xbf16>, vector<128x128xbf16>, vector<128x128xf32> -> vector<128x128xf32>
    %c0_27 = arith.constant 0 : index
    %c896 = arith.constant 896 : index
    %50 = vector.load %arg7[%c0_27, %c896] : memref<1x1024xf32, #tpu.memory_space<vmem>>, vector<1x128xf32>
    %51 = vector.broadcast %50 : vector<1x128xf32> to vector<128x128xf32>
    %52 = arith.addf %49, %51 : vector<128x128xf32>
    %c0_28 = arith.constant 0 : index
    %c0_29 = arith.constant 0 : index
    %53 = vector.load %arg8[%c0_28, %c0_29] : memref<128x384xf32, #tpu.memory_space<vmem>>, vector<128x128xf32>
    tpu.vector_store %arg8[%c0_28, %c0_29], %47 {strides = array<i32>} : memref<128x384xf32, #tpu.memory_space<vmem>>, vector<128x128xf32>,
    %c0_30 = arith.constant 0 : index
    %c128 = arith.constant 128 : index
    %54 = vector.load %arg8[%c0_30, %c128] : memref<128x384xf32, #tpu.memory_space<vmem>>, vector<128x128xf32>
    tpu.vector_store %arg8[%c0_30, %c128], %22 {strides = array<i32>} : memref<128x384xf32, #tpu.memory_space<vmem>>, vector<128x128xf32>,
    %c0_31 = arith.constant 0 : index
    %c256_32 = arith.constant 256 : index
    %55 = vector.load %arg8[%c0_31, %c256_32] : memref<128x384xf32, #tpu.memory_space<vmem>>, vector<128x128xf32>
    tpu.vector_store %arg8[%c0_31, %c256_32], %52 {strides = array<i32>} : memref<128x384xf32, #tpu.memory_space<vmem>>, vector<128x128xf32>,
    return
  }
  func.func @transform_0(%arg0: i32) -> (i32, i32) {
    %c0_i32 = arith.constant 0 : i32
    %c0_i32_0 = arith.constant 0 : i32
    return %arg0, %c0_i32 : i32, i32
  }
  func.func @transform_1(%arg0: i32) -> (i32, i32) {
    %c0_i32 = arith.constant 0 : i32
    %c0_i32_0 = arith.constant 0 : i32
    %c0_i32_1 = arith.constant 0 : i32
    return %c0_i32, %c0_i32_0 : i32, i32
  }
  func.func @transform_2(%arg0: i32) -> (i32, i32) {
    %c0_i32 = arith.constant 0 : i32
    %c0_i32_0 = arith.constant 0 : i32
    %c0_i32_1 = arith.constant 0 : i32
    return %c0_i32, %c0_i32_0 : i32, i32
  }
  func.func @transform_3(%arg0: i32) -> (i32, i32) {
    %c0_i32 = arith.constant 0 : i32
    %c0_i32_0 = arith.constant 0 : i32
    %c0_i32_1 = arith.constant 0 : i32
    return %c0_i32, %c0_i32_0 : i32, i32
  }
  func.func @transform_4(%arg0: i32) -> (i32, i32) {
    %c0_i32 = arith.constant 0 : i32
    %c0_i32_0 = arith.constant 0 : i32
    %c0_i32_1 = arith.constant 0 : i32
    return %c0_i32, %c0_i32_0 : i32, i32
  }
  func.func @transform_5(%arg0: i32) -> (i32, i32) {
    %c0_i32 = arith.constant 0 : i32
    %c0_i32_0 = arith.constant 0 : i32
    %c0_i32_1 = arith.constant 0 : i32
    return %c0_i32, %c0_i32_0 : i32, i32
  }
  func.func @transform_6(%arg0: i32) -> (i32, i32) {
    %c0_i32 = arith.constant 0 : i32
    %c0_i32_0 = arith.constant 0 : i32
    %c0_i32_1 = arith.constant 0 : i32
    return %c0_i32, %c0_i32_0 : i32, i32
  }
  func.func @transform_7(%arg0: i32) -> (i32, i32) {
    %c0_i32 = arith.constant 0 : i32
    %c0_i32_0 = arith.constant 0 : i32
    return %arg0, %c0_i32 : i32, i32
  }
}

</mosaic_0001>

<bundles_post_ra>
// kernel: tpu_custom_call.1
= control target key start
LH: loop header
LB: loop body
LE: loop exit
PB: predicated region body
PF: predicated region fallthrough
CT: control target
= control target key end

     0   :  { %s3497_s0 = inlined_call_operand.vmem [shape: f32[256,32], index: 0, kind: input, shape index: {}]   ;;  %s3498_s1 = inlined_call_operand.hbm [shape: bf16[32,256], index: 1, kind: input, shape index: {}]   ;;  %s3499_s2 = inlined_call_operand.vmem [shape: bf16[256,128], index: 2, kind: input, shape index: {}]   ;;  %s3500_s3 = inlined_call_operand.vmem [shape: bf16[128,384], index: 3, kind: input, shape index: {}]   ;;  %s3501_s4 = inlined_call_operand.hbm [shape: bf16[256,128], index: 4, kind: input, shape index: {}]   ;;  %s3502_s5 = inlined_call_operand.hbm [shape: bf16[128,128], index: 5, kind: input, shape index: {}]   ;;  %s3503_s6 = inlined_call_operand.vmem [shape: f32[1,1024], index: 6, kind: input, shape index: {}]   ;;  %s3504_s7 = inlined_call_operand.hbm [shape: f32[256,384], index: 7, kind: output, shape index: {}]  }
   0x1   :  { %3511 = sst [smem:[#allocation14_spill]] %s3501_s4 }
   0x2   :  { %12 = vsyncpa [#allocation3], 0 }
   0x3   :  { %13 = vsyncpa [#allocation6], 0 }
   0x4   :  { %14 = vsyncpa [#allocation4], 0 }
   0x5   :  { %16 = vsyncpa [#allocation4 + $0x1], 0  ;;  %s2894_s24 = smov 0   ;;  %s2896_s25 = smov 0  }
   0x6   :  { %s2898_s26 = smov 0   ;;  %s2900_s27 = smov 0  }
   0x7 LB: > { %3512 = sst [smem:[#allocation12_spill]] %s2837_s26  ;;  %s2915_s28 = sadd.s32 4294967295, %s2841_s27   ;;  %s2841_s27 = sphi %s2900_s27, %s3533_s27   ;;  %s2837_s26 = sphi %s2898_s26, %s3530_s26   ;;  %s2833_s25 = sphi %s2896_s25, %s3532_s25   ;;  %s2829_s24 = sphi %s2894_s24, %s3531_s24  }
   0x8   : > { %s2130_s29 = sadd.s32 4294967294, %s2841_s27   ;;  %s2919_s30 = sadd.s32 1, %s2841_s27  }
   0x9   : > { %s181_s8 = sadd.s32 1, %s2837_s26  ;;  %s178_s9 = ssub.s32 %s2841_s27, %s2919_s30 }
   0xa   : > { %p191_p0 = scmp.ne.s32.totalorder %s2837_s26, %s2833_s25  ;;  %p179_p1 = scmp.eq.s32.totalorder %s178_s9, 0 }
   0xb   : > { %p192_p2 = scmp.eq.s32.totalorder %s2915_s28, 1  ;;  %p197_p3 = scmp.ne.s32.totalorder %s2833_s25, %s2829_s24 }
   0xc   : > { %p198_p4 = scmp.eq.s32.totalorder %s2130_s29, 1  ;;  %p2131_p7 = scmp.ge.s32.totalorder %s2841_s27, 1 }
   0xd   : > { %s2930_s10 = scalar_select %p179_p1, %s2837_s26, %s181_s8  }
   0xe   : > { %p2932_p5 = por %p192_p2, %p191_p0  ;;  %p2936_p6 = por %p198_p4, %p197_p3 }
   0xf   : > { %3513 = sst [smem:[#allocation13_spill]] %s2930_s10  ;;  %p205_p8 = scmp.lt.s32.totalorder %s2841_s27, 3 }
  0x10   : > { %s3514_s11 = scalar_select %p2932_p5, 1, 0 }
  0x11   : > { %s3515_s12 = scalar_select %p2936_p6, 1, 0 }
  0x12   : > { %p3505_p9 = scmp.eq.s32.totalorder %s2915_s28, 0  ;;  %p2943_p10 = pnand %p2131_p7, %p205_p8 }
  0x13   : > { %s2843_s14 = smov [#allocation5]   ;;  %s2844_s17 = smov [#allocation2]  }
  0x14   : > { %s3516_s13 = scalar_select %p2943_p10, 1, 0 }
  0x15   : > { %s236_s15 = sshll.u32 %s2843_s14, 4  ;;  %p2482_p11 = pneg %p2943_p10  ;;  %s237_s15 = int_to_ptr.vmem [resolvable:$true] %s236_s15 }
  0x16   : > { %s217_s18 = sshll.u32 %s2844_s17, 4  ;;  %s3518_s4 = sld [smem:[#allocation14_spill]]  ;;  %s2955_s18 = int_to_ptr.vmem [resolvable:$true] %s217_s18 }
  0x17   : > { %p2951_p12 = pnand %p3505_p9, %p2482_p11 }
  0x19   : > { %p2965_p0 = pneg %p2951_p12 }
  0x1c   : > { %s2687_s21 = scalar_lea.hbm %s3518_s4, 2048 }
  0x1d   : > { %p2688_p13 = scmp.ne.s32.totalorder %s3518_s4, %s2687_s21  ;;  %p2694_p3 = scmp.lt.u32.totalorder %s2687_s21, %s3518_s4 }
  0x1f   : > { %p2690_p1 = pnand %p2965_p0, %p2688_p13 }
  0x21   : > { %p2691_p2 = pneg %p2690_p1 }
  0x23   : > { %p2696_p4 = pnand %p2694_p3, %p2691_p2 }
  0x25   : > { %2699 = shalt.err (!%p2696_p4)
}
  0x26   : > { %s2700_s14 = scalar_lea.vmem %s237_s15, 2048  ;;  %p2708_p9 = scmp.lt.s32.totalorder %s237_s15, %s237_s15 }
  0x27   : > { %p2701_p7 = scmp.ne.s32.totalorder %s237_s15, %s2700_s14  ;;  %p2709_p6 = scmp.lt.s32.totalorder %s2700_s14, %s2700_s14 }
  0x29   : > { %p2703_p8 = pnand %p2701_p7, %p2965_p0  ;;  %p2710_p5 = por %p2709_p6, %p2708_p9 }
  0x2b   : > { %p2704_p11 = pneg %p2703_p8 }
  0x2d   : > { %p2711_p10 = pnand %p2710_p5, %p2704_p11 }
  0x2f   : > { %2714 = shalt.err (!%p2711_p10)
}
  0x30   : > { %s3509_s17 = smov 64   ;;  %s3510_s19 = smov 4  }
  0x31   : > { %2488 = dma.hbm_to_vmem [thread:$0]  (!%p2951_p12), %s3518_s4, 2048, %s237_s15, [#allocation6], %s3509_s17, %s3509_s17, %s3510_s19  }
  0x32   : > { %s2715_s8 = scalar_lea.hbm %s3498_s1, 512 }
  0x33   : > { %p2716_p5 = scmp.ne.s32.totalorder %s3498_s1, %s2715_s8  ;;  %p2722_p10 = scmp.lt.u32.totalorder %s2715_s8, %s3498_s1 }
  0x35   : > { %p2718_p6 = pnand %p2716_p5, %p2965_p0 }
  0x37   : > { %p2719_p9 = pneg %p2718_p6 }
  0x39   : > { %p2724_p13 = pnand %p2722_p10, %p2719_p9 }
  0x3b   : > { %2727 = shalt.err (!%p2724_p13)
}
  0x3c   : > { %s2728_s15 = scalar_lea.vmem %s2955_s18, 512  ;;  %p2736_p4 = scmp.lt.s32.totalorder %s2955_s18, %s2955_s18 }
  0x3d   : > { %p2729_p1 = scmp.ne.s32.totalorder %s2955_s18, %s2728_s15  ;;  %p2737_p7 = scmp.lt.s32.totalorder %s2728_s15, %s2728_s15 }
  0x3f   : > { %p2731_p2 = pnand %p2729_p1, %p2965_p0  ;;  %p2738_p8 = por %p2737_p7, %p2736_p4 }
  0x41   : > { %p2732_p3 = pneg %p2731_p2 }
  0x43   : > { %p2739_p11 = pnand %p2738_p8, %p2732_p3 }
  0x45   : > { %2742 = shalt.err (!%p2739_p11)
}
  0x46   : > { %s2847_s20 = smov 128   ;;  %s2848_s26 = smov 8  }
  0x47   : > { %2485 = dma.hbm_to_vmem [thread:$0]  (!%p2951_p12), %s3498_s1, 512, %s2955_s18, [#allocation3], %s2847_s20, %s2847_s20, %s2848_s26  }
  0x48   : > { %s2849_s22 = smov [#allocation7]   ;;  %s2743_s14 = scalar_lea.hbm %s3502_s5, 1024 }
  0x49   : > { %s249_s23 = sshll.u32 %s2849_s22, 4  ;;  %p2744_p5 = scmp.ne.s32.totalorder %s3502_s5, %s2743_s14  ;;  %s250_s23 = int_to_ptr.vmem [resolvable:$true] %s249_s23 }
  0x4a   : > { %p2750_p10 = scmp.lt.u32.totalorder %s2743_s14, %s3502_s5 }
  0x4b   : > { %p2746_p6 = pnand %p2744_p5, %p2965_p0 }
  0x4d   : > { %p2747_p9 = pneg %p2746_p6 }
  0x4f   : > { %p2752_p13 = pnand %p2750_p10, %p2747_p9 }
  0x51   : > { %2755 = shalt.err (!%p2752_p13)
}
  0x52   : > { %s2756_s18 = scalar_lea.vmem %s250_s23, 1024  ;;  %p2764_p4 = scmp.lt.s32.totalorder %s250_s23, %s250_s23 }
  0x53   : > { %p2757_p1 = scmp.ne.s32.totalorder %s250_s23, %s2756_s18  ;;  %p2765_p7 = scmp.lt.s32.totalorder %s2756_s18, %s2756_s18 }
  0x55   : > { %p2759_p2 = pnand %p2757_p1, %p2965_p0  ;;  %p2766_p8 = por %p2765_p7, %p2764_p4 }
  0x57   : > { %p2760_p3 = pneg %p2759_p2 }
  0x59   : > { %p2767_p11 = pnand %p2766_p8, %p2760_p3 }
  0x5b   : > { %2770 = shalt.err (!%p2767_p11)
}
  0x5c   : > { %s3520_s17 = smov 4   ;;  %s3521_s20 = smov 64  }
  0x5d   : > { %2491 = dma.hbm_to_vmem [thread:$0]  (!%p2951_p12), %s3502_s5, 1024, %s250_s23, [#allocation6], %s3521_s20, %s3521_s20, %s3520_s17  }
  0x5e   : > { %p3522_p5 = scmp.ne.s32.totalorder %s3516_s13, 0 }
  0x5f   : > { %p3523_p0 = scmp.eq.s32.totalorder (!%p3522_p5), %s2915_s28, 0 }
  0x60   : > { %277 = sbr.rel (%p3522_p5) target bundleno = 1105 (0x451), region = 48 }
  0x67   : > { %2816 = dma.done.wait (%p3523_p0), [#allocation3], 512   ;;  %p3524_p6 = pmov %p3523_p0 }
  0x68   : > { %p3525_p9 = pmov %p3523_p0 }
  0x69   : > { %2818 = vsyncadd (%p3524_p6), [#allocation3], 4294966784 }
  0x6a   : > { %2820 = dma.done.wait (%p3525_p9), [#allocation6], 3072   ;;  %p3526_p10 = pmov %p3523_p0 }
  0x6b   : > { %s2140_s16 = sshll.u32 %s2915_s28, 4  ;;  %v2850_v0 = vmov 0   ;;  %v2545_v1 = vld [vmem:[#allocation2 + $0x4] ss:$8 sps:$4 sm:$0xff]   ;;  %v2547_v2 = vld [vmem:[#allocation2] ss:$8 sps:$4 sm:$0xff]   ;;  %v355_v60 = vlaneseq }
  0x6c   : > { %2822 = vsyncadd (%p3526_p10), [#allocation6], 4294964224  ;;  %442 = vmatprep.mubr.bf16.mxu0 %v2850_v0  ;;  %p318_p12 = scmp.lt.s32.totalorder %s2140_s16, 31  ;;  %410 = vmatprep.subr.bf16.mxu0 %v2545_v1  ;;  %v2548_v3 = vld [vmem:[#allocation2 + $0x14] ss:$8 sps:$4 sm:$0xff]   ;;  %vm385_vm0 = vcmask 261120  }
  0x6d   : > { %411 = vmatpush1.bf16.msra.mxu0 %v2547_v2  ;;  %v2550_v4 = vld [vmem:[#allocation2 + $0x10] ss:$8 sps:$4 sm:$0xff]   ;;  %v2551_v8 = vld [vmem:[%s3499_s2 + $0x40] sm:$0xff]   ;;  %v2553_v12 = vld [vmem:[%s3499_s2 + $0x48] sm:$0xff]   ;;  %v3173_v61 = vshrl.u32 %v355_v60, 7  ;;  %s314_s29 = sand.u32 1, %s2833_s25  }
  0x6e   : > { %s3535_s16 = smov (!%p318_p12, %s2140_s16), 31  ;;  %412 = vmatprep.subr.bf16.mxu0 %v2548_v3  ;;  %v2552_v11 = vld [vmem:[%s3499_s2] sm:$0xff]   ;;  %2242 = vmatprep.subr.bf16.mxu1 %v2551_v8  ;;  %v2554_v13 = vld [vmem:[%s3499_s2 + $0x8] sm:$0xff]   ;;  %v2555_v14 = vld [vmem:[%s3499_s2 + $0x50] sm:$0xff]   ;;  %s2466_s22 = smul.u32 384, %s314_s29 }
  0x6f   : > { %s2141_s13 = sshll.u32 %s3535_s16, 3  ;;  %2243 = vmatpush3.bf16.msra.mxu1 %v2552_v11  ;;  %v2556_v16 = vld [vmem:[%s3499_s2 + $0x10] sm:$0xff]   ;;  %v2557_v17 = vld [vmem:[%s3499_s2 + $0x58] sm:$0xff]   ;;  %v2559_v21 = vld [vmem:[%s3499_s2 + $0x60] sm:$0xff]   ;;  %v357_v62 = vsub.s32 0, %v3173_v61  ;;  %v361_v1 = vsub.s32 1, %v3173_v61 }
  0x70   : > { %s3043_s10 = scalar_lea.vmem %s3497_s0, %s2141_s13  ;;  %2244 = vmatprep.subr.bf16.mxu1 %v2553_v12  ;;  %v2558_v20 = vld [vmem:[%s3499_s2 + $0x18] sm:$0xff]   ;;  %v2560_v22 = vld [vmem:[%s3499_s2 + $0x20] sm:$0xff]   ;;  %v2561_v39 = vld [vmem:[%s3499_s2 + $0x68] sm:$0xff]   ;;  %s3258_s23 = scalar_lea.vmem [#allocation8], %s2466_s22 }
  0x71   : > { %v325_v5 = vld [vmem:[%s3043_s10] sm:$0xff]  ;;  %v326_v6 = vld [vmem:[%s3043_s10 + $0x8] sm:$0xff]  ;;  %413 = vmatpush1.bf16.msra.mxu0 %v2550_v4  ;;  %v327_v9 = vld [vmem:[%s3043_s10 + $0x10] sm:$0xff]  ;;  %s2467_s20 = smul.u32 6144, %s2915_s28  ;;  %s3456_s13 = scalar_lea.sflag [#allocation4], %s314_s29 }
  0x72   : > { %v341_v7 = vpack.c.bf16 %v326_v6, %v325_v5  ;;  %v328_v10 = vld [vmem:[%s3043_s10 + $0x18] sm:$0xff]  ;;  %v329_v18 = vld [vmem:[%s3043_s10 + $0x20] sm:$0xff]  ;;  %v330_v19 = vld [vmem:[%s3043_s10 + $0x28] sm:$0xff]  ;;  %p3527_p1 = scmp.ne.s32.totalorder %s3514_s11, 0  ;;  %s2851_s28 = smov [#allocation8]  }
  0x73   : > { %v342_v15 = vpack.c.bf16 %v328_v10, %v327_v9  ;;  %2245 = vmatpush3.bf16.msra.mxu1 %v2554_v13  ;;  %v343_v23 = vpack.c.bf16 %v330_v19, %v329_v18  ;;  %v331_v24 = vld [vmem:[%s3043_s10 + $0x30] sm:$0xff]  ;;  %v332_v25 = vld [vmem:[%s3043_s10 + $0x38] sm:$0xff]  ;;  %v333_v27 = vld [vmem:[%s3043_s10 + $0x40] sm:$0xff]  ;;  %s3448_s16 = scalar_lea.hbm %s3504_s7, %s2467_s20  ;;  %s2775_s21 = sshll.u32 %s2851_s28, 4  ;;  %s2776_s21 = int_to_ptr.vmem [resolvable:$false] %s2775_s21 }
  0x74   : > { %2146 = vmatmul.mubr.msk.bf16.vlgmr.msra.gmra.mrb[0].mxu0 %vm385_vm0, %v341_v7  ;;  %2246 = vmatprep.subr.bf16.mxu1 %v2555_v14  ;;  %v344_v26 = vpack.c.bf16 %v332_v25, %v331_v24  ;;  %v334_v28 = vld [vmem:[%s3043_s10 + $0x48] sm:$0xff]  ;;  %v335_v30 = vld [vmem:[%s3043_s10 + $0x50] sm:$0xff]  ;;  %v336_v31 = vld [vmem:[%s3043_s10 + $0x58] sm:$0xff]  ;;  %s2777_s22 = scalar_lea.vmem %s2776_s21, 12288 }
  0x75   : > { %452 = vmatprep.mubr.bf16.mxu0 %v2850_v0  ;;  %v345_v29 = vpack.c.bf16 %v334_v28, %v333_v27  ;;  %v346_v32 = vpack.c.bf16 %v336_v31, %v335_v30  ;;  %v337_v33 = vld [vmem:[%s3043_s10 + $0x60] sm:$0xff]  ;;  %v338_v34 = vld [vmem:[%s3043_s10 + $0x68] sm:$0xff]  ;;  %v339_v36 = vld [vmem:[%s3043_s10 + $0x70] sm:$0xff] }
  0x76   : > { %v347_v35 = vpack.c.bf16 %v338_v34, %v337_v33  ;;  %v340_v37 = vld [vmem:[%s3043_s10 + $0x78] sm:$0xff]  ;;  %v2562_v40 = vld [vmem:[%s3499_s2 + $0x28] sm:$0xff]   ;;  %v2563_v41 = vld [vmem:[%s3499_s2 + $0x70] sm:$0xff]   ;;  %s2037_s10 = sshll.u32 %s3258_s23, 4  ;;  %s3450_s10 = int_to_ptr.vmem [resolvable:$true] %s2037_s10 }
  0x77   : > { %2247 = vmatpush3.bf16.msra.mxu1 %v2556_v16  ;;  %v348_v38 = vpack.c.bf16 %v340_v37, %v339_v36  ;;  %v2564_v42 = vld [vmem:[%s3499_s2 + $0x30] sm:$0xff]   ;;  %v2565_v43 = vld [vmem:[%s3499_s2 + $0x78] sm:$0xff]   ;;  %v2567_v45 = vld [vmem:[%s3500_s3] ss:$12 sps:$4 sm:$0xff]   ;;  %s2771_s26 = scalar_lea.vmem %s3450_s10, 6144  ;;  %p2778_p4 = scmp.lt.s32.totalorder %s3450_s10, %s2776_s21 }
  0x78   : > { %2248 = vmatprep.subr.bf16.mxu1 %v2557_v17  ;;  %v2566_v44 = vld [vmem:[%s3499_s2 + $0x38] sm:$0xff]   ;;  %v2569_v46 = vld [vmem:[%s3500_s3 + $0x4] ss:$12 sps:$4 sm:$0xff]   ;;  %v2575_v49 = vld [vmem:[%s3500_s3 + $0x34] ss:$12 sps:$4 sm:$0xff]   ;;  %p2772_p13 = scmp.ne.s32.totalorder %s3450_s10, %s2771_s26  ;;  %p2779_p7 = scmp.lt.s32.totalorder %s2777_s22, %s2771_s26 }
  0x79   : > { %v2572_v47 = vld [vmem:[%s3500_s3 + $0x1c] ss:$12 sps:$4 sm:$0xff]   ;;  %1100 = vmatprep.subr.bf16.mxu0 %v2569_v46  ;;  %v2570_v48 = vld [vmem:[%s3500_s3 + $0x18] ss:$12 sps:$4 sm:$0xff]   ;;  %v2579_v55 = vld [vmem:[%s3500_s3 + $0x60] ss:$12 sps:$4 sm:$0xff]  }
  0x7a   : > { %1101 = vmatpush1.bf16.msra.mxu0 %v2567_v45  ;;  %v3143_v50 = vld [vmem:[%s3500_s3 + $0x8] ss:$12 sps:$4 sm:$0xff]   ;;  %v2573_v51 = vld [vmem:[%s3500_s3 + $0x30] ss:$12 sps:$4 sm:$0xff]   ;;  %v2578_v52 = vld [vmem:[%s3500_s3 + $0x4c] ss:$12 sps:$4 sm:$0xff]   ;;  %p2773_p2 = pnand %p2772_p13, %p3527_p1  ;;  %p2780_p8 = por %p2779_p7, %p2778_p4 }
  0x7b   : > { %2249 = vmatpush3.bf16.msra.mxu1 %v2558_v20  ;;  %1102 = vmatprep.subr.bf16.mxu0 %v2572_v47  ;;  %v2576_v53 = vld [vmem:[%s3500_s3 + $0x48] ss:$12 sps:$4 sm:$0xff]   ;;  %v2581_v54 = vld [vmem:[%s3500_s3 + $0x64] ss:$12 sps:$4 sm:$0xff]   ;;  %v353_v63 = vld [vmem:[%s3503_s6] sm:$0x3] }
  0x7c   : > { %2147 = vmatmul.mubr.msk.bf16.gmra.mrb[4].mxu0 %vm385_vm0, %v342_v15  ;;  %2250 = vmatprep.subr.bf16.mxu1 %v2559_v21  ;;  %v2584_v56 = vld [vmem:[%s3500_s3 + $0x7c] ss:$12 sps:$4 sm:$0xff]   ;;  %v2582_v57 = vld [vmem:[%s3500_s3 + $0x78] ss:$12 sps:$4 sm:$0xff]   ;;  %v2589_v58 = vld [vmem:[%s3500_s3 + $0x94] ss:$12 sps:$4 sm:$0xff]   ;;  %v3182_v2 = vrot.slane %v353_v63, %v357_v62  ;;  %v3186_v3 = vrot.slane %v353_v63, %v361_v1  ;;  %p2774_p3 = pneg %p2773_p2 }
  0x7d   : > { %462 = vmatprep.mubr.bf16.mxu0 %v2850_v0  ;;  %v2587_v59 = vld [vmem:[%s3500_s3 + $0x90] ss:$12 sps:$4 sm:$0xff]   ;;  %v2586_v27 = vld [vmem:[%s3500_s3 + $0x20] ss:$12 sps:$4 sm:$0xff]  }
  0x7e   : > { %1103 = vmatpush1.bf16.msra.mxu0 %v2570_v48  ;;  %p2781_p11 = pnand %p2780_p8, %p2774_p3 }
  0x7f   : > { %2251 = vmatpush3.bf16.msra.mxu1 %v2560_v22  ;;  %1104 = vmatprep.subr.bf16.mxu0 %v2575_v49 }
  0x80   : > { %2252 = vmatprep.subr.bf16.mxu1 %v2561_v39 }
  0x82   : > { %1105 = vmatpush1.bf16.msra.mxu0 %v2573_v51 }
  0x83   : > { %2253 = vmatpush3.bf16.msra.mxu1 %v2562_v40  ;;  %1106 = vmatprep.subr.bf16.mxu0 %v2578_v52 }
  0x84   : > { %2148 = vmatmul.mubr.msk.bf16.gmra.mrb[8].mxu0 %vm385_vm0, %v343_v23  ;;  %2254 = vmatprep.subr.bf16.mxu1 %v2563_v41 }
  0x85   : > { %472 = vmatprep.mubr.bf16.mxu0 %v2850_v0 }
  0x86   : > { %1107 = vmatpush1.bf16.msra.mxu0 %v2576_v53 }
  0x87   : > { %2255 = vmatpush3.bf16.msra.mxu1 %v2564_v42  ;;  %1108 = vmatprep.subr.bf16.mxu0 %v2581_v54 }
  0x88   : > { %2256 = vmatprep.subr.bf16.mxu1 %v2565_v43 }
  0x8a   : > { %1109 = vmatpush1.bf16.msra.mxu0 %v2579_v55 }
  0x8b   : > { %2257 = vmatpush3.bf16.msra.mxu1 %v2566_v44  ;;  %1110 = vmatprep.subr.bf16.mxu0 %v2584_v56 }
  0x8c   : > { %2149 = vmatmul.mubr.msk.bf16.gmra.mrb[12].mxu0 %vm385_vm0, %v344_v26  ;;  %2402 = vmatprep.subr.bf16.mxu1 %v3143_v50 }
  0x8d   : > { %482 = vmatprep.mubr.bf16.mxu0 %v2850_v0 }
  0x8e   : > { %1111 = vmatpush1.bf16.msra.mxu0 %v2582_v57 }
  0x8f   : > { %1112 = vmatprep.subr.bf16.mxu0 %v2589_v58 }
  0x92   : > { %1113 = vmatpush1.bf16.msra.mxu0 %v2587_v59 }
  0x94   : > { %2150 = vmatmul.mubr.msk.bf16.gmra.mrb[16].mxu0 %vm385_vm0, %v345_v29 }
  0x95   : > { %492 = vmatprep.mubr.bf16.mxu0 %v2850_v0 }
  0x9c   : > { %2151 = vmatmul.mubr.msk.bf16.gmra.mrb[20].mxu0 %vm385_vm0, %v346_v32 }
  0x9d   : > { %502 = vmatprep.mubr.bf16.mxu0 %v2850_v0 }
  0xa4   : > { %2152 = vmatmul.mubr.msk.bf16.gmra.mrb[24].mxu0 %vm385_vm0, %v347_v35  ;;  %v2590_v35 = vld [vmem:[%s3500_s3 + $0x38] ss:$12 sps:$4 sm:$0xff]  }
  0xa5   : > { %512 = vmatprep.mubr.bf16.mxu0 %v2850_v0 }
  0xac   : > { %2153 = vmatmul.mubr.msk.bf16.gmra.mrb[28].mxu0 %vm385_vm0, %v348_v38 }
  0xad   : > { %1132 = vmatprep.mubr.bf16.mxu0 %v2850_v0 }
 0x147   : > { %v444_v4 = vpop.f32.mrb[0].mxu0 }
 0x148   : > { %v445_v5 = vadd.f32 %v444_v4, %v3182_v2  ;;  %v446_v6 = vpop.f32.mrb[1].mxu0 }
 0x149   : > { %v447_v7 = vadd.f32 %v446_v6, %v3186_v3  ;;  %v448_v8 = vpop.f32.mrb[2].mxu0 }
 0x14a   : > { %v555_v9 = vmul.f32 0.01, %v445_v5  ;;  %v449_v10 = vadd.f32 %v448_v8, %v3182_v2  ;;  %v450_v11 = vpop.f32.mrb[3].mxu0  ;;  %vm523_vm1 = vcmp.gt.f32.partialorder %v445_v5, 0.0 }
 0x14b   : > { %v556_v12 = vmul.f32 0.01, %v447_v7  ;;  %v451_v13 = vadd.f32 %v450_v11, %v3186_v3  ;;  %vm524_vm3 = vcmp.gt.f32.partialorder %v447_v7, 0.0 }
 0x14c   : > { %vm525_vm2 = vcmp.gt.f32.partialorder %v449_v10, 0.0  ;;  %v557_v14 = vmul.f32 0.01, %v449_v10  ;;  %v587_v16 = vsel %vm523_vm1, %v445_v5, %v555_v9 }
 0x14d   : > { %v558_v15 = vmul.f32 0.01, %v451_v13  ;;  %vm526_vm4 = vcmp.gt.f32.partialorder %v451_v13, 0.0  ;;  %v588_v19 = vsel %vm524_vm3, %v447_v7, %v556_v12 }
 0x14e   : > { %v589_v17 = vsel %vm525_vm2, %v449_v10, %v557_v14 }
 0x14f   : > { %v454_v18 = vpop.f32.mrb[4].mxu0  ;;  %v590_v20 = vsel %vm526_vm4, %v451_v13, %v558_v15  ;;  %v619_v21 = vpack.c.bf16 %v589_v17, %v587_v16 }
 0x150   : > { %v455_v22 = vadd.f32 %v454_v18, %v3182_v2  ;;  %v456_v23 = vpop.f32.mrb[5].mxu0  ;;  %v620_v24 = vpack.c.bf16 %v590_v20, %v588_v19 }
 0x151   : > { %v457_v25 = vadd.f32 %v456_v23, %v3186_v3  ;;  %v458_v26 = vpop.f32.mrb[6].mxu0 }
 0x152   : > { %v559_v28 = vmul.f32 0.01, %v455_v22  ;;  %v459_v29 = vadd.f32 %v458_v26, %v3182_v2  ;;  %v460_v30 = vpop.f32.mrb[7].mxu0  ;;  %802 = vmatprep.mubr.bf16.mxu1 %v620_v24  ;;  %vm527_vm5 = vcmp.gt.f32.partialorder %v455_v22, 0.0 }
 0x153   : > { %v560_v31 = vmul.f32 0.01, %v457_v25  ;;  %v461_v32 = vadd.f32 %v460_v30, %v3186_v3  ;;  %803 = vmatmul.mubr.bf16.vlgmr.msra.gmra.mrb[0].mxu1 %v619_v21  ;;  %vm528_vm6 = vcmp.gt.f32.partialorder %v457_v25, 0.0 }
 0x154   : > { %vm529_vm7 = vcmp.gt.f32.partialorder %v459_v29, 0.0  ;;  %v561_v33 = vmul.f32 0.01, %v459_v29  ;;  %2403 = vmatpush3.bf16.msra.mxu1 %v3143_v50  ;;  %v591_v36 = vsel %vm527_vm5, %v455_v22, %v559_v28 }
 0x155   : > { %vm530_vm8 = vcmp.gt.f32.partialorder %v461_v32, 0.0  ;;  %v562_v34 = vmul.f32 0.01, %v461_v32  ;;  %2404 = vmatprep.subr.bf16.mxu1 %v2586_v27  ;;  %v592_v39 = vsel %vm528_vm6, %v457_v25, %v560_v31 }
 0x156   : > { %v593_v37 = vsel %vm529_vm7, %v459_v29, %v561_v33 }
 0x157   : > { %v464_v38 = vpop.f32.mrb[8].mxu0  ;;  %v594_v40 = vsel %vm530_vm8, %v461_v32, %v562_v34  ;;  %v621_v41 = vpack.c.bf16 %v593_v37, %v591_v36 }
 0x158   : > { %v465_v42 = vadd.f32 %v464_v38, %v3182_v2  ;;  %v466_v43 = vpop.f32.mrb[9].mxu0  ;;  %v622_v44 = vpack.c.bf16 %v594_v40, %v592_v39  ;;  %2405 = vmatpush3.bf16.msra.mxu1 %v2586_v27 }
 0x159   : > { %v467_v45 = vadd.f32 %v466_v43, %v3186_v3  ;;  %v468_v46 = vpop.f32.mrb[10].mxu0  ;;  %2406 = vmatprep.subr.bf16.mxu1 %v2590_v35 }
 0x15a   : > { %v563_v47 = vmul.f32 0.01, %v465_v42  ;;  %v469_v48 = vadd.f32 %v468_v46, %v3182_v2  ;;  %v470_v49 = vpop.f32.mrb[11].mxu0  ;;  %810 = vmatprep.mubr.bf16.mxu1 %v622_v44  ;;  %vm531_vm9 = vcmp.gt.f32.partialorder %v465_v42, 0.0 }
 0x15b   : > { %v564_v50 = vmul.f32 0.01, %v467_v45  ;;  %v471_v51 = vadd.f32 %v470_v49, %v3186_v3  ;;  %811 = vmatmul.mubr.bf16.gmra.mrb[4].mxu1 %v621_v41  ;;  %vm532_vm10 = vcmp.gt.f32.partialorder %v467_v45, 0.0 }
 0x15c   : > { %vm533_vm11 = vcmp.gt.f32.partialorder %v469_v48, 0.0  ;;  %v565_v52 = vmul.f32 0.01, %v469_v48  ;;  %2407 = vmatpush3.bf16.msra.mxu1 %v2590_v35  ;;  %v595_v54 = vsel %vm531_vm9, %v465_v42, %v563_v47 }
 0x15d   : > { %vm534_vm12 = vcmp.gt.f32.partialorder %v471_v51, 0.0  ;;  %v566_v53 = vmul.f32 0.01, %v471_v51  ;;  %v596_v57 = vsel %vm532_vm10, %v467_v45, %v564_v50 }
 0x15e   : > { %v597_v55 = vsel %vm533_vm11, %v469_v48, %v565_v52 }
 0x15f   : > { %v474_v56 = vpop.f32.mrb[12].mxu0  ;;  %v598_v58 = vsel %vm534_vm12, %v471_v51, %v566_v53  ;;  %v623_v59 = vpack.c.bf16 %v597_v55, %v595_v54 }
 0x160   : > { %v475_v60 = vadd.f32 %v474_v56, %v3182_v2  ;;  %v476_v63 = vpop.f32.mrb[13].mxu0  ;;  %v624_v4 = vpack.c.bf16 %v598_v58, %v596_v57 }
 0x161   : > { %v477_v5 = vadd.f32 %v476_v63, %v3186_v3  ;;  %v478_v6 = vpop.f32.mrb[14].mxu0 }
 0x162   : > { %v567_v7 = vmul.f32 0.01, %v475_v60  ;;  %v479_v8 = vadd.f32 %v478_v6, %v3182_v2  ;;  %v480_v9 = vpop.f32.mrb[15].mxu0  ;;  %818 = vmatprep.mubr.bf16.mxu1 %v624_v4  ;;  %vm535_vm13 = vcmp.gt.f32.partialorder %v475_v60, 0.0 }
 0x163   : > { %v568_v10 = vmul.f32 0.01, %v477_v5  ;;  %v481_v11 = vadd.f32 %v480_v9, %v3186_v3  ;;  %819 = vmatmul.mubr.bf16.gmra.mrb[8].mxu1 %v623_v59  ;;  %vm536_vm14 = vcmp.gt.f32.partialorder %v477_v5, 0.0 }
 0x164   : > { %vm537_vm15 = vcmp.gt.f32.partialorder %v479_v8, 0.0  ;;  %v569_v12 = vmul.f32 0.01, %v479_v8  ;;  %v599_v14 = vsel %vm535_vm13, %v475_v60, %v567_v7 }
 0x165   : > { %vm538_vm0 = vcmp.gt.f32.partialorder %v481_v11, 0.0  ;;  %v570_v13 = vmul.f32 0.01, %v481_v11  ;;  %v600_v17 = vsel %vm536_vm14, %v477_v5, %v568_v10 }
 0x166   : > { %v601_v15 = vsel %vm537_vm15, %v479_v8, %v569_v12 }
 0x167   : > { %v484_v16 = vpop.f32.mrb[16].mxu0  ;;  %v602_v18 = vsel %vm538_vm0, %v481_v11, %v570_v13  ;;  %v625_v19 = vpack.c.bf16 %v601_v15, %v599_v14 }
 0x168   : > { %v485_v20 = vadd.f32 %v484_v16, %v3182_v2  ;;  %v486_v21 = vpop.f32.mrb[17].mxu0  ;;  %v626_v22 = vpack.c.bf16 %v602_v18, %v600_v17 }
 0x169   : > { %v487_v23 = vadd.f32 %v486_v21, %v3186_v3  ;;  %v488_v24 = vpop.f32.mrb[18].mxu0 }
 0x16a   : > { %v571_v25 = vmul.f32 0.01, %v485_v20  ;;  %v489_v26 = vadd.f32 %v488_v24, %v3182_v2  ;;  %v490_v27 = vpop.f32.mrb[19].mxu0  ;;  %826 = vmatprep.mubr.bf16.mxu1 %v626_v22  ;;  %vm539_vm1 = vcmp.gt.f32.partialorder %v485_v20, 0.0 }
 0x16b   : > { %v572_v28 = vmul.f32 0.01, %v487_v23  ;;  %v491_v29 = vadd.f32 %v490_v27, %v3186_v3  ;;  %827 = vmatmul.mubr.bf16.gmra.mrb[12].mxu1 %v625_v19  ;;  %vm540_vm2 = vcmp.gt.f32.partialorder %v487_v23, 0.0 }
 0x16c   : > { %vm541_vm3 = vcmp.gt.f32.partialorder %v489_v26, 0.0  ;;  %v573_v30 = vmul.f32 0.01, %v489_v26  ;;  %v603_v32 = vsel %vm539_vm1, %v485_v20, %v571_v25 }
 0x16d   : > { %vm542_vm4 = vcmp.gt.f32.partialorder %v491_v29, 0.0  ;;  %v574_v31 = vmul.f32 0.01, %v491_v29  ;;  %v604_v35 = vsel %vm540_vm2, %v487_v23, %v572_v28 }
 0x16e   : > { %v605_v33 = vsel %vm541_vm3, %v489_v26, %v573_v30 }
 0x16f   : > { %v494_v34 = vpop.f32.mrb[20].mxu0  ;;  %v606_v36 = vsel %vm542_vm4, %v491_v29, %v574_v31  ;;  %v627_v37 = vpack.c.bf16 %v605_v33, %v603_v32 }
 0x170   : > { %v495_v38 = vadd.f32 %v494_v34, %v3182_v2  ;;  %v496_v39 = vpop.f32.mrb[21].mxu0  ;;  %v628_v40 = vpack.c.bf16 %v606_v36, %v604_v35  ;;  %v2594_v34 = vld [vmem:[%s3500_s3 + $0xac] ss:$12 sps:$4 sm:$0xff]   ;;  %v2592_v36 = vld [vmem:[%s3500_s3 + $0xa8] ss:$12 sps:$4 sm:$0xff]  }
 0x171   : > { %v497_v41 = vadd.f32 %v496_v39, %v3186_v3  ;;  %v498_v42 = vpop.f32.mrb[22].mxu0  ;;  %v2596_v35 = vld [vmem:[%s3500_s3 + $0x80] ss:$12 sps:$4 sm:$0xff]   ;;  %1114 = vmatprep.subr.bf16.mxu0 %v2594_v34 }
 0x172   : > { %v575_v43 = vmul.f32 0.01, %v495_v38  ;;  %v499_v44 = vadd.f32 %v498_v42, %v3182_v2  ;;  %v500_v45 = vpop.f32.mrb[23].mxu0  ;;  %834 = vmatprep.mubr.bf16.mxu1 %v628_v40  ;;  %vm543_vm5 = vcmp.gt.f32.partialorder %v495_v38, 0.0  ;;  %1115 = vmatpush1.bf16.msra.mxu0 %v2592_v36  ;;  %v2599_v39 = vld [vmem:[#allocation5 + $0x40] sm:$0xff]  }
 0x173   : > { %v576_v46 = vmul.f32 0.01, %v497_v41  ;;  %v501_v47 = vadd.f32 %v500_v45, %v3186_v3  ;;  %835 = vmatmul.mubr.bf16.gmra.mrb[16].mxu1 %v627_v37  ;;  %vm544_vm6 = vcmp.gt.f32.partialorder %v497_v41, 0.0  ;;  %v2597_v37 = vld [vmem:[%s3500_s3 + $0x98] ss:$12 sps:$4 sm:$0xff]  }
 0x174   : > { %vm545_vm7 = vcmp.gt.f32.partialorder %v499_v44, 0.0  ;;  %v577_v48 = vmul.f32 0.01, %v499_v44  ;;  %v607_v50 = vsel %vm543_vm5, %v495_v38, %v575_v43  ;;  %v2598_v38 = vld [vmem:[%s3500_s3 + $0xb0] ss:$12 sps:$4 sm:$0xff]   ;;  %v2605_v40 = vld [vmem:[#allocation7] sm:$0xff]  }
 0x175   : > { %vm546_vm8 = vcmp.gt.f32.partialorder %v501_v47, 0.0  ;;  %v578_v49 = vmul.f32 0.01, %v501_v47  ;;  %v608_v53 = vsel %vm544_vm6, %v497_v41, %v576_v46  ;;  %2434 = vmatprep.subr.bf16.mxu0 %v2605_v40  ;;  %v3252_v42 = vld [vmem:[%s3503_s6 + $0x2] ss:$0 sm:$0xff] }
 0x176   : > { %v609_v51 = vsel %vm545_vm7, %v499_v44, %v577_v48 }
 0x177   : > { %v504_v52 = vpop.f32.mrb[24].mxu0  ;;  %v610_v54 = vsel %vm546_vm8, %v501_v47, %v578_v49  ;;  %v629_v55 = vpack.c.bf16 %v609_v51, %v607_v50 }
 0x178   : > { %v505_v56 = vadd.f32 %v504_v52, %v3182_v2  ;;  %v506_v57 = vpop.f32.mrb[25].mxu0  ;;  %v630_v58 = vpack.c.bf16 %v610_v54, %v608_v53 }
 0x179   : > { %v507_v59 = vadd.f32 %v506_v57, %v3186_v3  ;;  %v508_v60 = vpop.f32.mrb[26].mxu0 }
 0x17a   : > { %v579_v63 = vmul.f32 0.01, %v505_v56  ;;  %v509_v4 = vadd.f32 %v508_v60, %v3182_v2  ;;  %v510_v5 = vpop.f32.mrb[27].mxu0  ;;  %842 = vmatprep.mubr.bf16.mxu1 %v630_v58  ;;  %vm547_vm9 = vcmp.gt.f32.partialorder %v505_v56, 0.0  ;;  %v2608_v60 = vld [vmem:[#allocation7 + $0x8] sm:$0xff]  }
 0x17b   : > { %v580_v6 = vmul.f32 0.01, %v507_v59  ;;  %v511_v7 = vadd.f32 %v510_v5, %v3186_v3  ;;  %843 = vmatmul.mubr.bf16.gmra.mrb[20].mxu1 %v629_v55  ;;  %vm548_vm10 = vcmp.gt.f32.partialorder %v507_v59, 0.0 }
 0x17c   : > { %vm549_vm11 = vcmp.gt.f32.partialorder %v509_v4, 0.0  ;;  %v581_v8 = vmul.f32 0.01, %v509_v4  ;;  %v611_v10 = vsel %vm547_vm9, %v505_v56, %v579_v63 }
 0x17d   : > { %vm550_vm12 = vcmp.gt.f32.partialorder %v511_v7, 0.0  ;;  %v582_v9 = vmul.f32 0.01, %v511_v7  ;;  %v612_v13 = vsel %vm548_vm10, %v507_v59, %v580_v6 }
 0x17e   : > { %v613_v11 = vsel %vm549_vm11, %v509_v4, %v581_v8 }
 0x17f   : > { %v514_v12 = vpop.f32.mrb[28].mxu0  ;;  %v614_v14 = vsel %vm550_vm12, %v511_v7, %v582_v9  ;;  %v631_v15 = vpack.c.bf16 %v613_v11, %v611_v10  ;;  %v2611_v7 = vld [vmem:[#allocation7 + $0x10] sm:$0xff]  }
 0x180   : > { %v515_v16 = vadd.f32 %v514_v12, %v3182_v2  ;;  %v516_v17 = vpop.f32.mrb[29].mxu0  ;;  %v632_v18 = vpack.c.bf16 %v614_v14, %v612_v13 }
 0x181   : > { %v517_v19 = vadd.f32 %v516_v17, %v3186_v3  ;;  %v518_v20 = vpop.f32.mrb[30].mxu0 }
 0x182   : > { %v583_v21 = vmul.f32 0.01, %v515_v16  ;;  %v519_v22 = vadd.f32 %v518_v20, %v3182_v2  ;;  %v520_v23 = vpop.f32.mrb[31].mxu0  ;;  %850 = vmatprep.mubr.bf16.mxu1 %v632_v18  ;;  %vm551_vm13 = vcmp.gt.f32.partialorder %v515_v16, 0.0  ;;  %v2591_v2 = vld [vmem:[%s3500_s3 + $0x50] ss:$12 sps:$4 sm:$0xff]  }
 0x183   : > { %v584_v24 = vmul.f32 0.01, %v517_v19  ;;  %v521_v25 = vadd.f32 %v520_v23, %v3186_v3  ;;  %851 = vmatmul.mubr.bf16.gmra.mrb[24].mxu1 %v631_v15  ;;  %vm552_vm14 = vcmp.gt.f32.partialorder %v517_v19, 0.0  ;;  %2408 = vmatprep.subr.bf16.mxu1 %v2591_v2  ;;  %v2595_v3 = vld [vmem:[%s3500_s3 + $0x68] ss:$12 sps:$4 sm:$0xff]   ;;  %v2600_v15 = vld [vmem:[#allocation5] sm:$0xff]  }
 0x184   : > { %vm553_vm15 = vcmp.gt.f32.partialorder %v519_v22, 0.0  ;;  %v585_v26 = vmul.f32 0.01, %v519_v22  ;;  %v615_v28 = vsel %vm551_vm13, %v515_v16, %v583_v21  ;;  %2409 = vmatpush3.bf16.msra.mxu1 %v2591_v2  ;;  %v2601_v18 = vld [vmem:[#allocation5 + $0x48] sm:$0xff]  }
 0x185   : > { %vm554_vm0 = vcmp.gt.f32.partialorder %v521_v25, 0.0  ;;  %v586_v27 = vmul.f32 0.01, %v521_v25  ;;  %v616_v30 = vsel %vm552_vm14, %v517_v19, %v584_v24  ;;  %2410 = vmatprep.subr.bf16.mxu1 %v2595_v3  ;;  %v2602_v23 = vld [vmem:[#allocation5 + $0x8] sm:$0xff]   ;;  %v2603_v24 = vld [vmem:[#allocation5 + $0x50] sm:$0xff]  }
 0x186   : > { %v617_v29 = vsel %vm553_vm15, %v519_v22, %v585_v26 }
 0x187   : > { %v618_v31 = vsel %vm554_vm0, %v521_v25, %v586_v27  ;;  %v633_v32 = vpack.c.bf16 %v617_v29, %v615_v28 }
 0x188   : > { %v634_v33 = vpack.c.bf16 %v618_v31, %v616_v30  ;;  %2411 = vmatpush3.bf16.msra.mxu1 %v2595_v3  ;;  %v2606_v3 = vld [vmem:[#allocation5 + $0x58] sm:$0xff]  }
 0x189   : > { %2412 = vmatprep.subr.bf16.mxu1 %v2596_v35 }
 0x18a   : > { %858 = vmatprep.mubr.bf16.mxu1 %v634_v33 }
 0x18b   : > { %859 = vmatmul.mubr.bf16.gmra.mrb[28].mxu1 %v633_v32  ;;  %v2604_v32 = vld [vmem:[#allocation5 + $0x10] sm:$0xff]  }
 0x18c   : > { %2413 = vmatpush3.bf16.msra.mxu1 %v2596_v35 }
 0x18d   : > { %2414 = vmatprep.subr.bf16.mxu1 %v2597_v37 }
 0x190   : > { %2415 = vmatpush3.bf16.msra.mxu1 %v2597_v37 }
 0x191   : > { %2416 = vmatprep.subr.bf16.mxu1 %v2598_v38 }
 0x194   : > { %2417 = vmatpush3.bf16.msra.mxu1 %v2598_v38  ;;  %v2607_v38 = vld [vmem:[#allocation5 + $0x18] sm:$0xff]  }
 0x195   : > { %2322 = vmatprep.subr.bf16.mxu1 %v2599_v39  ;;  %v2609_v39 = vld [vmem:[#allocation5 + $0x60] sm:$0xff]  }
 0x226   : > { %v2258_v41 = vpop.f32.mrb[0].mxu1 }
 0x227   : > { %v2259_v43 = vpop.f32.mrb[1].mxu1 }
 0x228   : > { %v2260_v44 = vadd.f32 %v2259_v43, %v2258_v41  ;;  %v2261_v45 = vpop.f32.mrb[2].mxu1 }
 0x229   : > { %v2262_v46 = vpop.f32.mrb[3].mxu1 }
 0x22a   : > { %v805_v47 = vadd.f32 %v2260_v44, %v3252_v42  ;;  %v2263_v48 = vadd.f32 %v2262_v46, %v2261_v45 }
 0x22c   : > { %vm867_vm1 = vcmp.gt.f32.partialorder %v805_v47, 0.0  ;;  %v883_v49 = vmul.f32 0.01, %v805_v47  ;;  %v808_v50 = vadd.f32 %v2263_v48, %v3252_v42  ;;  %v2610_v48 = vld [vmem:[#allocation5 + $0x20] sm:$0xff]  }
 0x22e   : > { %v899_v51 = vsel %vm867_vm1, %v805_v47, %v883_v49  ;;  %vm868_vm2 = vcmp.gt.f32.partialorder %v808_v50, 0.0  ;;  %v884_v52 = vmul.f32 0.01, %v808_v50  ;;  %v2264_v53 = vpop.f32.mrb[4].mxu1 }
 0x22f   : > { %1990 = vst [vmem:[%s3258_s23 + $0x8] sm:$0xff] %v899_v51  ;;  %v2265_v54 = vpop.f32.mrb[5].mxu1 }
 0x230   : > { %v900_v55 = vsel %vm868_vm2, %v808_v50, %v884_v52  ;;  %v2266_v56 = vadd.f32 %v2265_v54, %v2264_v53  ;;  %v2267_v57 = vpop.f32.mrb[6].mxu1 }
 0x231   : > { %v915_v58 = vpack.c.bf16 %v900_v55, %v899_v51  ;;  %1991 = vst [vmem:[%s3258_s23 + $0x20] sm:$0xff] %v900_v55  ;;  %v2268_v59 = vpop.f32.mrb[7].mxu1  ;;  %v2612_v51 = vld [vmem:[#allocation5 + $0x68] sm:$0xff]  }
 0x232   : > { %v813_v63 = vadd.f32 %v2266_v56, %v3252_v42  ;;  %v2269_v4 = vadd.f32 %v2268_v59, %v2267_v57 }
 0x233   : > { %1133 = vmatmul.mubr.bf16.vlgmr.msra.gmra.mrb[32].mxu0 %v915_v58  ;;  %2418 = vmatprep.mubr.bf16.mxu1 %v915_v58 }
 0x234   : > { %vm869_vm3 = vcmp.gt.f32.partialorder %v813_v63, 0.0  ;;  %v885_v5 = vmul.f32 0.01, %v813_v63  ;;  %v816_v6 = vadd.f32 %v2269_v4, %v3252_v42  ;;  %1142 = vmatprep.mubr.bf16.mxu0 %v2850_v0  ;;  %2435 = vmatpush3.bf16.msra.mxu0 %v2605_v40 }
 0x235   : > { %2436 = vmatprep.subr.bf16.mxu0 %v2608_v60 }
 0x236   : > { %vm870_vm4 = vcmp.gt.f32.partialorder %v816_v6, 0.0  ;;  %v886_v8 = vmul.f32 0.01, %v816_v6  ;;  %v2270_v9 = vpop.f32.mrb[8].mxu1  ;;  %v901_v10 = vsel %vm869_vm3, %v813_v63, %v885_v5 }
 0x237   : > { %v2271_v11 = vpop.f32.mrb[9].mxu1  ;;  %1992 = vst [vmem:[%s3258_s23 + $0x38] sm:$0xff] %v901_v10 }
 0x238   : > { %v2272_v12 = vadd.f32 %v2271_v11, %v2270_v9  ;;  %v2273_v13 = vpop.f32.mrb[10].mxu1  ;;  %v902_v14 = vsel %vm870_vm4, %v816_v6, %v886_v8  ;;  %2437 = vmatpush3.bf16.msra.mxu0 %v2608_v60 }
 0x239   : > { %v2274_v16 = vpop.f32.mrb[11].mxu1  ;;  %v916_v17 = vpack.c.bf16 %v902_v14, %v901_v10  ;;  %1993 = vst [vmem:[%s3258_s23 + $0x50] sm:$0xff] %v902_v14  ;;  %2438 = vmatprep.subr.bf16.mxu0 %v2611_v7 }
 0x23a   : > { %v821_v19 = vadd.f32 %v2272_v12, %v3252_v42  ;;  %v2275_v20 = vadd.f32 %v2274_v16, %v2273_v13 }
 0x23b   : > { %1143 = vmatmul.mubr.bf16.gmra.mrb[36].mxu0 %v916_v17  ;;  %2419 = vmatmul.mubr.bf16.vlgmr.msra.gmra.mrb[32].mxu1 %v916_v17 }
 0x23c   : > { %vm871_vm5 = vcmp.gt.f32.partialorder %v821_v19, 0.0  ;;  %v887_v21 = vmul.f32 0.01, %v821_v19  ;;  %v824_v22 = vadd.f32 %v2275_v20, %v3252_v42  ;;  %1152 = vmatprep.mubr.bf16.mxu0 %v2850_v0  ;;  %2323 = vmatpush3.bf16.msra.mxu1 %v2600_v15 }
 0x23d   : > { %2324 = vmatprep.subr.bf16.mxu1 %v2601_v18  ;;  %2439 = vmatpush3.bf16.msra.mxu0 %v2611_v7 }
 0x23e   : > { %vm872_vm6 = vcmp.gt.f32.partialorder %v824_v22, 0.0  ;;  %v888_v25 = vmul.f32 0.01, %v824_v22  ;;  %v2276_v26 = vpop.f32.mrb[12].mxu1  ;;  %v903_v27 = vsel %vm871_vm5, %v821_v19, %v887_v21 }
 0x23f   : > { %v2277_v28 = vpop.f32.mrb[13].mxu1  ;;  %1994 = vst [vmem:[%s3258_s23 + $0x68] sm:$0xff] %v903_v27 }
 0x240   : > { %v2278_v29 = vadd.f32 %v2277_v28, %v2276_v26  ;;  %v2279_v30 = vpop.f32.mrb[14].mxu1  ;;  %v904_v31 = vsel %vm872_vm6, %v824_v22, %v888_v25  ;;  %2325 = vmatpush3.bf16.msra.mxu1 %v2602_v23 }
 0x241   : > { %v2280_v33 = vpop.f32.mrb[15].mxu1  ;;  %v917_v2 = vpack.c.bf16 %v904_v31, %v903_v27  ;;  %1995 = vst [vmem:[%s3258_s23 + $0x80] sm:$0xff] %v904_v31  ;;  %2326 = vmatprep.subr.bf16.mxu1 %v2603_v24 }
 0x242   : > { %v829_v34 = vadd.f32 %v2278_v29, %v3252_v42  ;;  %v2281_v35 = vadd.f32 %v2280_v33, %v2279_v30 }
 0x243   : > { %1153 = vmatmul.mubr.bf16.gmra.mrb[40].mxu0 %v917_v2  ;;  %2422 = vmatprep.mubr.bf16.mxu1 %v917_v2 }
 0x244   : > { %vm873_vm7 = vcmp.gt.f32.partialorder %v829_v34, 0.0  ;;  %v889_v36 = vmul.f32 0.01, %v829_v34  ;;  %v832_v37 = vadd.f32 %v2281_v35, %v3252_v42  ;;  %1162 = vmatprep.mubr.bf16.mxu0 %v2850_v0  ;;  %2327 = vmatpush3.bf16.msra.mxu1 %v2604_v32 }
 0x245   : > { %2328 = vmatprep.subr.bf16.mxu1 %v2606_v3 }
 0x246   : > { %vm874_vm8 = vcmp.gt.f32.partialorder %v832_v37, 0.0  ;;  %v890_v40 = vmul.f32 0.01, %v832_v37  ;;  %v2282_v41 = vpop.f32.mrb[16].mxu1  ;;  %v905_v43 = vsel %vm873_vm7, %v829_v34, %v889_v36 }
 0x247   : > { %v2283_v44 = vpop.f32.mrb[17].mxu1  ;;  %1996 = vst [vmem:[%s3258_s23 + $0x98] sm:$0xff] %v905_v43 }
 0x248   : > { %v2284_v45 = vadd.f32 %v2283_v44, %v2282_v41  ;;  %v2285_v46 = vpop.f32.mrb[18].mxu1  ;;  %v906_v47 = vsel %vm874_vm8, %v832_v37, %v890_v40  ;;  %2329 = vmatpush3.bf16.msra.mxu1 %v2607_v38  ;;  %v2613_v40 = vld [vmem:[#allocation5 + $0x28] sm:$0xff]   ;;  %v2615_v41 = vld [vmem:[#allocation5 + $0x70] sm:$0xff]  }
 0x249   : > { %v2286_v49 = vpop.f32.mrb[19].mxu1  ;;  %v918_v50 = vpack.c.bf16 %v906_v47, %v905_v43  ;;  %1997 = vst [vmem:[%s3258_s23 + $0xb0] sm:$0xff] %v906_v47  ;;  %2330 = vmatprep.subr.bf16.mxu1 %v2609_v39  ;;  %v2614_v39 = vld [vmem:[#allocation7 + $0x18] sm:$0xff]   ;;  %v2617_v43 = vld [vmem:[#allocation7 + $0x20] sm:$0xff]   ;;  %v2616_v44 = vld [vmem:[#allocation5 + $0x30] sm:$0xff]  }
 0x24a   : > { %v837_v52 = vadd.f32 %v2284_v45, %v3252_v42  ;;  %v2287_v53 = vadd.f32 %v2286_v49, %v2285_v46  ;;  %2440 = vmatprep.subr.bf16.mxu0 %v2614_v39  ;;  %v2619_v45 = vld [vmem:[#allocation5 + $0x38] sm:$0xff]   ;;  %v2621_v46 = vld [vmem:[#allocation7 + $0x30] sm:$0xff]  }
 0x24b   : > { %1163 = vmatmul.mubr.bf16.gmra.mrb[44].mxu0 %v918_v50  ;;  %2423 = vmatmul.mubr.bf16.gmra.mrb[36].mxu1 %v918_v50  ;;  %v2622_v47 = vld [vmem:[#allocation7 + $0x38] sm:$0xff]  }
 0x24c   : > { %vm875_vm9 = vcmp.gt.f32.partialorder %v837_v52, 0.0  ;;  %v891_v54 = vmul.f32 0.01, %v837_v52  ;;  %v840_v55 = vadd.f32 %v2287_v53, %v3252_v42  ;;  %1172 = vmatprep.mubr.bf16.mxu0 %v2850_v0  ;;  %2331 = vmatpush3.bf16.msra.mxu1 %v2610_v48  ;;  %v955_v48 = vld [vmem:[%s3503_s6 + $0x3] sm:$0x7] }
 0x24d   : > { %2332 = vmatprep.subr.bf16.mxu1 %v2612_v51  ;;  %2441 = vmatpush3.bf16.msra.mxu0 %v2614_v39  ;;  %v3302_v49 = vrot.slane %v955_v48, %v357_v62  ;;  %v3306_v50 = vrot.slane %v955_v48, %v361_v1 }
 0x24e   : > { %vm876_vm10 = vcmp.gt.f32.partialorder %v840_v55, 0.0  ;;  %v892_v56 = vmul.f32 0.01, %v840_v55  ;;  %v2288_v57 = vpop.f32.mrb[20].mxu1  ;;  %v907_v58 = vsel %vm875_vm9, %v837_v52, %v891_v54  ;;  %2442 = vmatprep.subr.bf16.mxu0 %v2617_v43  ;;  %v967_v54 = vsub.s32 2, %v3173_v61 }
 0x24f   : > { %v2289_v59 = vpop.f32.mrb[21].mxu1  ;;  %1998 = vst [vmem:[%s3258_s23 + $0xc8] sm:$0xff] %v907_v58 }
 0x250   : > { %v2290_v60 = vadd.f32 %v2289_v59, %v2288_v57  ;;  %v2291_v63 = vpop.f32.mrb[22].mxu1  ;;  %v908_v4 = vsel %vm876_vm10, %v840_v55, %v892_v56  ;;  %2333 = vmatpush3.bf16.msra.mxu1 %v2613_v40 }
 0x251   : > { %v2292_v5 = vpop.f32.mrb[23].mxu1  ;;  %v919_v6 = vpack.c.bf16 %v908_v4, %v907_v58  ;;  %1999 = vst [vmem:[%s3258_s23 + $0xe0] sm:$0xff] %v908_v4  ;;  %2334 = vmatprep.subr.bf16.mxu1 %v2615_v41  ;;  %2443 = vmatpush3.bf16.msra.mxu0 %v2617_v43 }
 0x252   : > { %v845_v7 = vadd.f32 %v2290_v60, %v3252_v42  ;;  %v2293_v8 = vadd.f32 %v2292_v5, %v2291_v63  ;;  %v3313_v63 = vrot.slane %v955_v48, %v967_v54 }
 0x253   : > { %1173 = vmatmul.mubr.bf16.gmra.mrb[48].mxu0 %v919_v6  ;;  %2426 = vmatprep.mubr.bf16.mxu1 %v919_v6 }
 0x254   : > { %vm877_vm11 = vcmp.gt.f32.partialorder %v845_v7, 0.0  ;;  %v893_v9 = vmul.f32 0.01, %v845_v7  ;;  %v848_v10 = vadd.f32 %v2293_v8, %v3252_v42  ;;  %1182 = vmatprep.mubr.bf16.mxu0 %v2850_v0  ;;  %2335 = vmatpush3.bf16.msra.mxu1 %v2616_v44 }
 0x256   : > { %vm878_vm12 = vcmp.gt.f32.partialorder %v848_v10, 0.0  ;;  %v894_v11 = vmul.f32 0.01, %v848_v10  ;;  %v2294_v12 = vpop.f32.mrb[24].mxu1  ;;  %v909_v13 = vsel %vm877_vm11, %v845_v7, %v893_v9 }
 0x257   : > { %v2295_v14 = vpop.f32.mrb[25].mxu1  ;;  %2000 = vst [vmem:[%s3258_s23 + $0xf8] sm:$0xff] %v909_v13 }
 0x258   : > { %v2296_v15 = vadd.f32 %v2295_v14, %v2294_v12  ;;  %v2297_v16 = vpop.f32.mrb[26].mxu1  ;;  %v910_v17 = vsel %vm878_vm12, %v848_v10, %v894_v11 }
 0x259   : > { %v2298_v18 = vpop.f32.mrb[27].mxu1  ;;  %v920_v19 = vpack.c.bf16 %v910_v17, %v909_v13  ;;  %2001 = vst [vmem:[%s3258_s23 + $0x110] sm:$0xff] %v910_v17 }
 0x25a   : > { %v853_v20 = vadd.f32 %v2296_v15, %v3252_v42  ;;  %v2299_v21 = vadd.f32 %v2298_v18, %v2297_v16 }
 0x25b   : > { %1183 = vmatmul.mubr.bf16.gmra.mrb[52].mxu0 %v920_v19  ;;  %2427 = vmatmul.mubr.bf16.gmra.mrb[40].mxu1 %v920_v19 }
 0x25c   : > { %vm879_vm13 = vcmp.gt.f32.partialorder %v853_v20, 0.0  ;;  %v895_v22 = vmul.f32 0.01, %v853_v20  ;;  %v856_v23 = vadd.f32 %v2299_v21, %v3252_v42  ;;  %1192 = vmatprep.mubr.bf16.mxu0 %v2850_v0 }
 0x25e   : > { %vm880_vm14 = vcmp.gt.f32.partialorder %v856_v23, 0.0  ;;  %v896_v24 = vmul.f32 0.01, %v856_v23  ;;  %v2300_v25 = vpop.f32.mrb[28].mxu1  ;;  %v911_v26 = vsel %vm879_vm13, %v853_v20, %v895_v22 }
 0x25f   : > { %v2301_v27 = vpop.f32.mrb[29].mxu1  ;;  %2002 = vst [vmem:[%s3258_s23 + $0x128] sm:$0xff] %v911_v26 }
 0x260   : > { %v2302_v28 = vadd.f32 %v2301_v27, %v2300_v25  ;;  %v2303_v29 = vpop.f32.mrb[30].mxu1  ;;  %v912_v30 = vsel %vm880_vm14, %v856_v23, %v896_v24 }
 0x261   : > { %v2304_v31 = vpop.f32.mrb[31].mxu1  ;;  %v921_v32 = vpack.c.bf16 %v912_v30, %v911_v26  ;;  %2003 = vst [vmem:[%s3258_s23 + $0x140] sm:$0xff] %v912_v30 }
 0x262   : > { %v861_v33 = vadd.f32 %v2302_v28, %v3252_v42  ;;  %v2305_v2 = vadd.f32 %v2304_v31, %v2303_v29 }
 0x263   : > { %1193 = vmatmul.mubr.bf16.gmra.mrb[56].mxu0 %v921_v32  ;;  %2430 = vmatprep.mubr.bf16.mxu1 %v921_v32 }
 0x264   : > { %vm881_vm15 = vcmp.gt.f32.partialorder %v861_v33, 0.0  ;;  %v897_v3 = vmul.f32 0.01, %v861_v33  ;;  %v864_v34 = vadd.f32 %v2305_v2, %v3252_v42  ;;  %1202 = vmatprep.mubr.bf16.mxu0 %v2850_v0  ;;  %v2618_v0 = vld [vmem:[#allocation5 + $0x78] sm:$0xff]   ;;  %v2620_v42 = vld [vmem:[#allocation7 + $0x28] sm:$0xff]  }
 0x265   : > { %2336 = vmatprep.subr.bf16.mxu1 %v2618_v0  ;;  %2444 = vmatprep.subr.bf16.mxu0 %v2620_v42 }
 0x266   : > { %vm882_vm0 = vcmp.gt.f32.partialorder %v864_v34, 0.0  ;;  %v898_v35 = vmul.f32 0.01, %v864_v34  ;;  %v913_v36 = vsel %vm881_vm15, %v861_v33, %v897_v3  ;;  %2337 = vmatpush3.bf16.msra.mxu1 %v2619_v45  ;;  %2445 = vmatpush3.bf16.msra.mxu0 %v2620_v42 }
 0x267   : > { %2004 = vst [vmem:[%s3258_s23 + $0x158] sm:$0xff] %v913_v36  ;;  %2446 = vmatprep.subr.bf16.mxu0 %v2621_v46 }
 0x268   : > { %v914_v37 = vsel %vm882_vm0, %v864_v34, %v898_v35 }
 0x269   : > { %v922_v38 = vpack.c.bf16 %v914_v37, %v913_v36  ;;  %2005 = vst [vmem:[%s3258_s23 + $0x170] sm:$0xff] %v914_v37 }
 0x26a   : > { %2447 = vmatpush3.bf16.msra.mxu0 %v2621_v46 }
 0x26b   : > { %1203 = vmatmul.mubr.bf16.gmra.mrb[60].mxu0 %v922_v38  ;;  %2431 = vmatmul.mubr.bf16.gmra.mrb[44].mxu1 %v922_v38 }
 0x26c   : > { %2448 = vmatprep.subr.bf16.mxu0 %v2622_v47 }
 0x26e   : > { %2449 = vmatpush3.bf16.msra.mxu0 %v2622_v47 }
 0x306   : > { %v1134_v51 = vpop.f32.mrb[32].mxu0 }
 0x307   : > { %v1135_v52 = vadd.f32 %v1134_v51, %v3302_v49  ;;  %v1136_v53 = vpop.f32.mrb[33].mxu0 }
 0x308   : > { %v1137_v55 = vadd.f32 %v1136_v53, %v3306_v50  ;;  %v1138_v56 = vpop.f32.mrb[34].mxu0 }
 0x309   : > { %v1358_v57 = vmul.f32 0.01, %v1135_v52  ;;  %v1139_v58 = vadd.f32 %v1138_v56, %v3302_v49  ;;  %v1140_v59 = vpop.f32.mrb[35].mxu0  ;;  %vm1310_vm1 = vcmp.gt.f32.partialorder %v1135_v52, 0.0 }
 0x30a   : > { %v1359_v62 = vmul.f32 0.01, %v1137_v55  ;;  %v1141_v60 = vadd.f32 %v1140_v59, %v3306_v50  ;;  %vm1311_vm2 = vcmp.gt.f32.partialorder %v1137_v55, 0.0 }
 0x30b   : > { %vm1313_vm3 = vcmp.gt.f32.partialorder %v1139_v58, 0.0  ;;  %v1361_v1 = vmul.f32 0.01, %v1139_v58  ;;  %v1406_v5 = vsel %vm1310_vm1, %v1135_v52, %v1358_v57 }
 0x30c   : > { %vm1314_vm4 = vcmp.gt.f32.partialorder %v1141_v60, 0.0  ;;  %v1362_v4 = vmul.f32 0.01, %v1141_v60  ;;  %v1407_v9 = vsel %vm1311_vm2, %v1137_v55, %v1359_v62 }
 0x30d   : > { %v1409_v61 = vsel %vm1313_vm3, %v1139_v58, %v1361_v1 }
 0x30e   : > { %v1454_v6 = vpack.c.bf16 %v1409_v61, %v1406_v5  ;;  %v1144_v7 = vpop.f32.mrb[36].mxu0  ;;  %v2420_v8 = vpop.f32.mrb[32].mxu1  ;;  %v1410_v10 = vsel %vm1314_vm4, %v1141_v60, %v1362_v4 }
 0x30f   : > { %v1145_v11 = vadd.f32 %v1144_v7, %v3302_v49  ;;  %v1256_v12 = vadd.f32 %v2420_v8, %v3313_v63  ;;  %v1146_v13 = vpop.f32.mrb[37].mxu0  ;;  %v1247_v14 = vpop.f32.mrb[33].mxu1  ;;  %v1455_v15 = vpack.c.bf16 %v1410_v10, %v1407_v9 }
 0x310   : > { %v1147_v16 = vadd.f32 %v1146_v13, %v3306_v50  ;;  %v1248_v17 = vadd.f32 %v1247_v14, %v3313_v63  ;;  %v1148_v18 = vpop.f32.mrb[38].mxu0  ;;  %v2421_v19 = vpop.f32.mrb[34].mxu1 }
 0x311   : > { %vm1316_vm5 = vcmp.gt.f32.partialorder %v1145_v11, 0.0  ;;  %v1364_v20 = vmul.f32 0.01, %v1145_v11  ;;  %vm1318_vm6 = vcmp.gt.f32.partialorder %v1256_v12, 0.0  ;;  %v1366_v21 = vmul.f32 0.01, %v1256_v12  ;;  %1645 = vmatprep.mubr.bf16.mxu1 %v1455_v15 }
 0x312   : > { %vm1317_vm7 = vcmp.gt.f32.partialorder %v1147_v16, 0.0  ;;  %v1365_v22 = vmul.f32 0.01, %v1147_v16  ;;  %1646 = vmatmul.mubr.bf16.vlgmr.msra.gmra.mrb[48].mxu1 %v1454_v6  ;;  %vm1312_vm8 = vcmp.gt.f32.partialorder %v1248_v17, 0.0  ;;  %v1360_v23 = vmul.f32 0.01, %v1248_v17 }
 0x313   : > { %v1149_v24 = vadd.f32 %v1148_v18, %v3302_v49  ;;  %v1259_v25 = vadd.f32 %v2421_v19, %v3313_v63  ;;  %v1150_v26 = vpop.f32.mrb[39].mxu0  ;;  %v1250_v27 = vpop.f32.mrb[35].mxu1  ;;  %v1414_v28 = vsel %vm1318_vm6, %v1256_v12, %v1366_v21  ;;  %v1412_v31 = vsel %vm1316_vm5, %v1145_v11, %v1364_v20 }
 0x314   : > { %v1151_v29 = vadd.f32 %v1150_v26, %v3306_v50  ;;  %v1251_v30 = vadd.f32 %v1250_v27, %v3313_v63  ;;  %v1413_v36 = vsel %vm1317_vm7, %v1147_v16, %v1365_v22  ;;  %v1408_v37 = vsel %vm1312_vm8, %v1248_v17, %v1360_v23 }
 0x315   : > { %vm1319_vm9 = vcmp.gt.f32.partialorder %v1149_v24, 0.0  ;;  %v1367_v32 = vmul.f32 0.01, %v1149_v24  ;;  %vm1321_vm10 = vcmp.gt.f32.partialorder %v1259_v25, 0.0  ;;  %v1369_v33 = vmul.f32 0.01, %v1259_v25 }
 0x316   : > { %vm1320_vm11 = vcmp.gt.f32.partialorder %v1151_v29, 0.0  ;;  %v1368_v2 = vmul.f32 0.01, %v1151_v29  ;;  %vm1315_vm12 = vcmp.gt.f32.partialorder %v1251_v30, 0.0  ;;  %v1363_v3 = vmul.f32 0.01, %v1251_v30 }
 0x317   : > { %v1417_v34 = vsel %vm1321_vm10, %v1259_v25, %v1369_v33  ;;  %v1154_v35 = vpop.f32.mrb[40].mxu0  ;;  %v1415_v38 = vsel %vm1319_vm9, %v1149_v24, %v1367_v32 }
 0x318   : > { %v1471_v39 = vpack.c.bf16 %v1417_v34, %v1414_v28  ;;  %v1155_v40 = vadd.f32 %v1154_v35, %v3302_v49  ;;  %v1156_v41 = vpop.f32.mrb[41].mxu0  ;;  %v1416_v43 = vsel %vm1320_vm11, %v1151_v29, %v1368_v2  ;;  %v1411_v44 = vsel %vm1315_vm12, %v1251_v30, %v1363_v3 }
 0x319   : > { %v1157_v0 = vadd.f32 %v1156_v41, %v3306_v50  ;;  %v1158_v42 = vpop.f32.mrb[42].mxu0  ;;  %v1457_v45 = vpack.c.bf16 %v1416_v43, %v1413_v36  ;;  %v1470_v46 = vpack.c.bf16 %v1411_v44, %v1408_v37  ;;  %v1456_v47 = vpack.c.bf16 %v1415_v38, %v1412_v31 }
 0x31a   : > { %v1370_v48 = vmul.f32 0.01, %v1155_v40  ;;  %v1159_v51 = vadd.f32 %v1158_v42, %v3302_v49  ;;  %v1160_v52 = vpop.f32.mrb[43].mxu0  ;;  %vm1322_vm13 = vcmp.gt.f32.partialorder %v1155_v40, 0.0 }
 0x31b   : > { %vm1323_vm14 = vcmp.gt.f32.partialorder %v1157_v0, 0.0  ;;  %v1371_v53 = vmul.f32 0.01, %v1157_v0  ;;  %v1161_v54 = vadd.f32 %v1160_v52, %v3306_v50  ;;  %1653 = vmatprep.mubr.bf16.mxu1 %v1457_v45  ;;  %2450 = vmatprep.mubr.bf16.mxu0 %v1470_v46 }
 0x31c   : > { %vm1325_vm15 = vcmp.gt.f32.partialorder %v1159_v51, 0.0  ;;  %v1373_v55 = vmul.f32 0.01, %v1159_v51  ;;  %1654 = vmatmul.mubr.bf16.gmra.mrb[52].mxu1 %v1456_v47  ;;  %2451 = vmatmul.mubr.bf16.vlgmr.msra.gmra.mrb[64].mxu0 %v1471_v39  ;;  %v1418_v62 = vsel %vm1322_vm13, %v1155_v40, %v1370_v48 }
 0x31d   : > { %vm1326_vm0 = vcmp.gt.f32.partialorder %v1161_v54, 0.0  ;;  %v1374_v56 = vmul.f32 0.01, %v1161_v54  ;;  %v1419_v59 = vsel %vm1323_vm14, %v1157_v0, %v1371_v53 }
 0x31e   : > { %v1164_v57 = vpop.f32.mrb[44].mxu0  ;;  %v2424_v58 = vpop.f32.mrb[36].mxu1  ;;  %v1421_v60 = vsel %vm1325_vm15, %v1159_v51, %v1373_v55 }
 0x31f   : > { %v1165_v1 = vadd.f32 %v1164_v57, %v3302_v49  ;;  %v1272_v4 = vadd.f32 %v2424_v58, %v3313_v63  ;;  %v1166_v5 = vpop.f32.mrb[45].mxu0  ;;  %v1263_v61 = vpop.f32.mrb[37].mxu1  ;;  %v1422_v6 = vsel %vm1326_vm0, %v1161_v54, %v1374_v56  ;;  %v1458_v7 = vpack.c.bf16 %v1421_v60, %v1418_v62 }
 0x320   : > { %v1167_v8 = vadd.f32 %v1166_v5, %v3306_v50  ;;  %v1264_v9 = vadd.f32 %v1263_v61, %v3313_v63  ;;  %v1168_v10 = vpop.f32.mrb[46].mxu0  ;;  %v2425_v11 = vpop.f32.mrb[38].mxu1  ;;  %v1459_v12 = vpack.c.bf16 %v1422_v6, %v1419_v59 }
 0x321   : > { %vm1328_vm1 = vcmp.gt.f32.partialorder %v1165_v1, 0.0  ;;  %v1376_v13 = vmul.f32 0.01, %v1165_v1  ;;  %vm1330_vm2 = vcmp.gt.f32.partialorder %v1272_v4, 0.0  ;;  %v1378_v14 = vmul.f32 0.01, %v1272_v4 }
 0x322   : > { %vm1329_vm3 = vcmp.gt.f32.partialorder %v1167_v8, 0.0  ;;  %v1377_v15 = vmul.f32 0.01, %v1167_v8  ;;  %1661 = vmatprep.mubr.bf16.mxu1 %v1459_v12  ;;  %vm1324_vm4 = vcmp.gt.f32.partialorder %v1264_v9, 0.0  ;;  %v1372_v16 = vmul.f32 0.01, %v1264_v9 }
 0x323   : > { %v1169_v17 = vadd.f32 %v1168_v10, %v3302_v49  ;;  %v1275_v18 = vadd.f32 %v2425_v11, %v3313_v63  ;;  %v1170_v19 = vpop.f32.mrb[47].mxu0  ;;  %v1266_v20 = vpop.f32.mrb[39].mxu1  ;;  %v1424_v23 = vsel %vm1328_vm1, %v1165_v1, %v1376_v13  ;;  %v1426_v24 = vsel %vm1330_vm2, %v1272_v4, %v1378_v14 }
 0x324   : > { %v1171_v21 = vadd.f32 %v1170_v19, %v3306_v50  ;;  %v1267_v22 = vadd.f32 %v1266_v20, %v3313_v63  ;;  %1662 = vmatmul.mubr.bf16.gmra.mrb[56].mxu1 %v1458_v7  ;;  %v1425_v30 = vsel %vm1329_vm3, %v1167_v8, %v1377_v15  ;;  %v1420_v31 = vsel %vm1324_vm4, %v1264_v9, %v1372_v16 }
 0x325   : > { %vm1331_vm5 = vcmp.gt.f32.partialorder %v1169_v17, 0.0  ;;  %v1379_v25 = vmul.f32 0.01, %v1169_v17  ;;  %vm1333_vm6 = vcmp.gt.f32.partialorder %v1275_v18, 0.0  ;;  %v1381_v26 = vmul.f32 0.01, %v1275_v18 }
 0x326   : > { %vm1332_vm7 = vcmp.gt.f32.partialorder %v1171_v21, 0.0  ;;  %v1380_v27 = vmul.f32 0.01, %v1171_v21  ;;  %vm1327_vm8 = vcmp.gt.f32.partialorder %v1267_v22, 0.0  ;;  %v1375_v28 = vmul.f32 0.01, %v1267_v22 }
 0x327   : > { %v1174_v29 = vpop.f32.mrb[48].mxu0  ;;  %v1427_v32 = vsel %vm1331_vm5, %v1169_v17, %v1379_v25  ;;  %v1429_v33 = vsel %vm1333_vm6, %v1275_v18, %v1381_v26 }
 0x328   : > { %v1175_v2 = vadd.f32 %v1174_v29, %v3302_v49  ;;  %v1176_v3 = vpop.f32.mrb[49].mxu0  ;;  %v1428_v34 = vsel %vm1332_vm7, %v1171_v21, %v1380_v27  ;;  %v1423_v35 = vsel %vm1327_vm8, %v1267_v22, %v1375_v28  ;;  %v1460_v36 = vpack.c.bf16 %v1427_v32, %v1424_v23 }
 0x329   : > { %v1177_v37 = vadd.f32 %v1176_v3, %v3306_v50  ;;  %v1178_v38 = vpop.f32.mrb[50].mxu0  ;;  %v1461_v39 = vpack.c.bf16 %v1428_v34, %v1425_v30  ;;  %v1472_v40 = vpack.c.bf16 %v1423_v35, %v1420_v31  ;;  %v1473_v41 = vpack.c.bf16 %v1429_v33, %v1426_v24 }
 0x32a   : > { %v1382_v43 = vmul.f32 0.01, %v1175_v2  ;;  %v1179_v44 = vadd.f32 %v1178_v38, %v3302_v49  ;;  %v1180_v0 = vpop.f32.mrb[51].mxu0  ;;  %vm1334_vm9 = vcmp.gt.f32.partialorder %v1175_v2, 0.0 }
 0x32b   : > { %vm1335_vm10 = vcmp.gt.f32.partialorder %v1177_v37, 0.0  ;;  %v1383_v42 = vmul.f32 0.01, %v1177_v37  ;;  %v1181_v45 = vadd.f32 %v1180_v0, %v3306_v50  ;;  %1669 = vmatprep.mubr.bf16.mxu1 %v1461_v39  ;;  %2454 = vmatprep.mubr.bf16.mxu0 %v1472_v40 }
 0x32c   : > { %vm1337_vm11 = vcmp.gt.f32.partialorder %v1179_v44, 0.0  ;;  %v1385_v46 = vmul.f32 0.01, %v1179_v44  ;;  %1670 = vmatmul.mubr.bf16.gmra.mrb[60].mxu1 %v1460_v36  ;;  %2455 = vmatmul.mubr.bf16.gmra.mrb[68].mxu0 %v1473_v41  ;;  %v1430_v53 = vsel %vm1334_vm9, %v1175_v2, %v1382_v43 }
 0x32d   : > { %vm1338_vm12 = vcmp.gt.f32.partialorder %v1181_v45, 0.0  ;;  %v1386_v47 = vmul.f32 0.01, %v1181_v45  ;;  %v1431_v52 = vsel %vm1335_vm10, %v1177_v37, %v1383_v42 }
 0x32e   : > { %v1184_v48 = vpop.f32.mrb[52].mxu0  ;;  %v2428_v51 = vpop.f32.mrb[40].mxu1  ;;  %v1433_v54 = vsel %vm1337_vm11, %v1179_v44, %v1385_v46 }
 0x32f   : > { %v1185_v55 = vadd.f32 %v1184_v48, %v3302_v49  ;;  %v1288_v56 = vadd.f32 %v2428_v51, %v3313_v63  ;;  %v1186_v57 = vpop.f32.mrb[53].mxu0  ;;  %v1279_v58 = vpop.f32.mrb[41].mxu1  ;;  %v1434_v59 = vsel %vm1338_vm12, %v1181_v45, %v1386_v47  ;;  %v1462_v62 = vpack.c.bf16 %v1433_v54, %v1430_v53 }
 0x330   : > { %v1187_v60 = vadd.f32 %v1186_v57, %v3306_v50  ;;  %v1280_v1 = vadd.f32 %v1279_v58, %v3313_v63  ;;  %v1188_v4 = vpop.f32.mrb[54].mxu0  ;;  %v2429_v5 = vpop.f32.mrb[42].mxu1  ;;  %v1463_v61 = vpack.c.bf16 %v1434_v59, %v1431_v52 }
 0x331   : > { %vm1340_vm13 = vcmp.gt.f32.partialorder %v1185_v55, 0.0  ;;  %v1388_v6 = vmul.f32 0.01, %v1185_v55  ;;  %vm1342_vm14 = vcmp.gt.f32.partialorder %v1288_v56, 0.0  ;;  %v1390_v7 = vmul.f32 0.01, %v1288_v56 }
 0x332   : > { %vm1341_vm15 = vcmp.gt.f32.partialorder %v1187_v60, 0.0  ;;  %v1389_v8 = vmul.f32 0.01, %v1187_v60  ;;  %1677 = vmatprep.mubr.bf16.mxu1 %v1463_v61  ;;  %vm1336_vm0 = vcmp.gt.f32.partialorder %v1280_v1, 0.0  ;;  %v1384_v9 = vmul.f32 0.01, %v1280_v1 }
 0x333   : > { %v1189_v10 = vadd.f32 %v1188_v4, %v3302_v49  ;;  %v1291_v11 = vadd.f32 %v2429_v5, %v3313_v63  ;;  %v1190_v12 = vpop.f32.mrb[55].mxu0  ;;  %v1282_v13 = vpop.f32.mrb[43].mxu1  ;;  %v1436_v16 = vsel %vm1340_vm13, %v1185_v55, %v1388_v6  ;;  %v1438_v17 = vsel %vm1342_vm14, %v1288_v56, %v1390_v7 }
 0x334   : > { %v1191_v14 = vadd.f32 %v1190_v12, %v3306_v50  ;;  %v1283_v15 = vadd.f32 %v1282_v13, %v3313_v63  ;;  %1678 = vmatmul.mubr.bf16.gmra.mrb[64].mxu1 %v1462_v62  ;;  %v1437_v23 = vsel %vm1341_vm15, %v1187_v60, %v1389_v8  ;;  %v1432_v24 = vsel %vm1336_vm0, %v1280_v1, %v1384_v9 }
 0x335   : > { %vm1343_vm1 = vcmp.gt.f32.partialorder %v1189_v10, 0.0  ;;  %v1391_v18 = vmul.f32 0.01, %v1189_v10  ;;  %vm1345_vm2 = vcmp.gt.f32.partialorder %v1291_v11, 0.0  ;;  %v1393_v19 = vmul.f32 0.01, %v1291_v11 }
 0x336   : > { %vm1344_vm3 = vcmp.gt.f32.partialorder %v1191_v14, 0.0  ;;  %v1392_v20 = vmul.f32 0.01, %v1191_v14  ;;  %vm1339_vm4 = vcmp.gt.f32.partialorder %v1283_v15, 0.0  ;;  %v1387_v21 = vmul.f32 0.01, %v1283_v15 }
 0x337   : > { %v1194_v22 = vpop.f32.mrb[56].mxu0  ;;  %v1439_v25 = vsel %vm1343_vm1, %v1189_v10, %v1391_v18  ;;  %v1441_v26 = vsel %vm1345_vm2, %v1291_v11, %v1393_v19 }
 0x338   : > { %v1195_v27 = vadd.f32 %v1194_v22, %v3302_v49  ;;  %v1196_v28 = vpop.f32.mrb[57].mxu0  ;;  %v1440_v29 = vsel %vm1344_vm3, %v1191_v14, %v1392_v20  ;;  %v1435_v30 = vsel %vm1339_vm4, %v1283_v15, %v1387_v21  ;;  %v1464_v31 = vpack.c.bf16 %v1439_v25, %v1436_v16 }
 0x339   : > { %v1197_v32 = vadd.f32 %v1196_v28, %v3306_v50  ;;  %v1198_v33 = vpop.f32.mrb[58].mxu0  ;;  %v1465_v2 = vpack.c.bf16 %v1440_v29, %v1437_v23  ;;  %v1474_v3 = vpack.c.bf16 %v1435_v30, %v1432_v24  ;;  %v1475_v34 = vpack.c.bf16 %v1441_v26, %v1438_v17  ;;  %v3374_v23 = vld [vmem:[%s3503_s6 + $0x6] ss:$0 sm:$0xff] }
 0x33a   : > { %v1394_v35 = vmul.f32 0.01, %v1195_v27  ;;  %v1199_v36 = vadd.f32 %v1198_v33, %v3302_v49  ;;  %v1200_v37 = vpop.f32.mrb[59].mxu0  ;;  %vm1346_vm5 = vcmp.gt.f32.partialorder %v1195_v27, 0.0  ;;  %v3381_v33 = vld [vmem:[%s3503_s6 + $0x7] ss:$0 sm:$0xff] }
 0x33b   : > { %vm1347_vm6 = vcmp.gt.f32.partialorder %v1197_v32, 0.0  ;;  %v1395_v38 = vmul.f32 0.01, %v1197_v32  ;;  %v1201_v39 = vadd.f32 %v1200_v37, %v3306_v50  ;;  %1685 = vmatprep.mubr.bf16.mxu1 %v1465_v2  ;;  %2458 = vmatprep.mubr.bf16.mxu0 %v1474_v3 }
 0x33c   : > { %vm1349_vm7 = vcmp.gt.f32.partialorder %v1199_v36, 0.0  ;;  %v1397_v40 = vmul.f32 0.01, %v1199_v36  ;;  %1686 = vmatmul.mubr.bf16.gmra.mrb[68].mxu1 %v1464_v31  ;;  %2459 = vmatmul.mubr.bf16.gmra.mrb[72].mxu0 %v1475_v34  ;;  %v1442_v42 = vsel %vm1346_vm5, %v1195_v27, %v1394_v35 }
 0x33d   : > { %vm1350_vm8 = vcmp.gt.f32.partialorder %v1201_v39, 0.0  ;;  %v1398_v41 = vmul.f32 0.01, %v1201_v39  ;;  %v1443_v0 = vsel %vm1347_vm6, %v1197_v32, %v1395_v38 }
 0x33e   : > { %v1204_v43 = vpop.f32.mrb[60].mxu0  ;;  %v2432_v44 = vpop.f32.mrb[44].mxu1  ;;  %v1445_v45 = vsel %vm1349_vm7, %v1199_v36, %v1397_v40 }
 0x33f   : > { %v1205_v46 = vadd.f32 %v1204_v43, %v3302_v49  ;;  %v1304_v47 = vadd.f32 %v2432_v44, %v3313_v63  ;;  %v1206_v48 = vpop.f32.mrb[61].mxu0  ;;  %v1295_v51 = vpop.f32.mrb[45].mxu1  ;;  %v1446_v52 = vsel %vm1350_vm8, %v1201_v39, %v1398_v41  ;;  %v1466_v53 = vpack.c.bf16 %v1445_v45, %v1442_v42 }
 0x340   : > { %v1207_v54 = vadd.f32 %v1206_v48, %v3306_v50  ;;  %v1296_v55 = vadd.f32 %v1295_v51, %v3313_v63  ;;  %v1208_v56 = vpop.f32.mrb[62].mxu0  ;;  %v2433_v57 = vpop.f32.mrb[46].mxu1  ;;  %v1467_v58 = vpack.c.bf16 %v1446_v52, %v1443_v0 }
 0x341   : > { %vm1352_vm9 = vcmp.gt.f32.partialorder %v1205_v46, 0.0  ;;  %v1400_v59 = vmul.f32 0.01, %v1205_v46  ;;  %vm1354_vm10 = vcmp.gt.f32.partialorder %v1304_v47, 0.0  ;;  %v1402_v62 = vmul.f32 0.01, %v1304_v47 }
 0x342   : > { %vm1353_vm11 = vcmp.gt.f32.partialorder %v1207_v54, 0.0  ;;  %v1401_v60 = vmul.f32 0.01, %v1207_v54  ;;  %1693 = vmatprep.mubr.bf16.mxu1 %v1467_v58  ;;  %vm1348_vm12 = vcmp.gt.f32.partialorder %v1296_v55, 0.0  ;;  %v1396_v1 = vmul.f32 0.01, %v1296_v55 }
 0x343   : > { %v1209_v4 = vadd.f32 %v1208_v56, %v3302_v49  ;;  %v1307_v5 = vadd.f32 %v2433_v57, %v3313_v63  ;;  %v1210_v61 = vpop.f32.mrb[63].mxu0  ;;  %v1298_v6 = vpop.f32.mrb[47].mxu1  ;;  %v1448_v9 = vsel %vm1352_vm9, %v1205_v46, %v1400_v59  ;;  %v1450_v10 = vsel %vm1354_vm10, %v1304_v47, %v1402_v62 }
 0x344   : > { %v1211_v7 = vadd.f32 %v1210_v61, %v3306_v50  ;;  %v1299_v8 = vadd.f32 %v1298_v6, %v3313_v63  ;;  %1694 = vmatmul.mubr.bf16.gmra.mrb[72].mxu1 %v1466_v53  ;;  %v1449_v14 = vsel %vm1353_vm11, %v1207_v54, %v1401_v60  ;;  %v1444_v15 = vsel %vm1348_vm12, %v1296_v55, %v1396_v1 }
 0x345   : > { %vm1355_vm13 = vcmp.gt.f32.partialorder %v1209_v4, 0.0  ;;  %v1403_v11 = vmul.f32 0.01, %v1209_v4  ;;  %vm1357_vm14 = vcmp.gt.f32.partialorder %v1307_v5, 0.0  ;;  %v1405_v12 = vmul.f32 0.01, %v1307_v5 }
 0x346   : > { %vm1356_vm15 = vcmp.gt.f32.partialorder %v1211_v7, 0.0  ;;  %v1404_v13 = vmul.f32 0.01, %v1211_v7  ;;  %vm1351_vm0 = vcmp.gt.f32.partialorder %v1299_v8, 0.0  ;;  %v1399_v49 = vmul.f32 0.01, %v1299_v8 }
 0x347   : > { %v1451_v16 = vsel %vm1355_vm13, %v1209_v4, %v1403_v11  ;;  %v1453_v50 = vsel %vm1357_vm14, %v1307_v5, %v1405_v12 }
 0x348   : > { %v1452_v17 = vsel %vm1356_vm15, %v1211_v7, %v1404_v13  ;;  %v1447_v63 = vsel %vm1351_vm0, %v1299_v8, %v1399_v49  ;;  %v1468_v18 = vpack.c.bf16 %v1451_v16, %v1448_v9  ;;  %v1477_v19 = vpack.c.bf16 %v1453_v50, %v1450_v10 }
 0x349   : > { %v1469_v20 = vpack.c.bf16 %v1452_v17, %v1449_v14  ;;  %v1476_v21 = vpack.c.bf16 %v1447_v63, %v1444_v15 }
 0x34b   : > { %1701 = vmatprep.mubr.bf16.mxu1 %v1469_v20  ;;  %2462 = vmatprep.mubr.bf16.mxu0 %v1476_v21 }
 0x34c   : > { %1702 = vmatmul.mubr.bf16.gmra.mrb[76].mxu1 %v1468_v18  ;;  %2463 = vmatmul.mubr.bf16.gmra.mrb[76].mxu0 %v1477_v19 }
 0x3e5   : > { %v2338_v22 = vpop.f32.mrb[48].mxu1 }
 0x3e6   : > { %v2339_v24 = vpop.f32.mrb[49].mxu1 }
 0x3e7   : > { %v2340_v25 = vadd.f32 %v2339_v24, %v2338_v22  ;;  %v2341_v26 = vpop.f32.mrb[50].mxu1 }
 0x3e8   : > { %v2342_v27 = vpop.f32.mrb[51].mxu1 }
 0x3e9   : > { %v1648_v28 = vadd.f32 %v2340_v25, %v3374_v23  ;;  %v2343_v29 = vadd.f32 %v2342_v27, %v2341_v26 }
 0x3eb   : > { %v2212_v30 = vmul.f32 -1.442695, %v1648_v28  ;;  %v1651_v31 = vadd.f32 %v2343_v29, %v3374_v23 }
 0x3ed   : > { %2623 = vpow2.f32 %v2212_v30  ;;  %v2213_v32 = vmul.f32 -1.442695, %v1651_v31 }
 0x3ef   : > { %2625 = vpow2.f32 %v2213_v32  ;;  %v2344_v2 = vpop.f32.mrb[52].mxu1  ;;  %v2452_v3 = vpop.f32.mrb[64].mxu0 }
 0x3f0   : > { %v1920_v34 = vadd.f32 %v2452_v3, %v3381_v33  ;;  %v2345_v35 = vpop.f32.mrb[53].mxu1  ;;  %v1911_v36 = vpop.f32.mrb[65].mxu0 }
 0x3f1   : > { %v2346_v37 = vadd.f32 %v2345_v35, %v2344_v2  ;;  %v1912_v38 = vadd.f32 %v3381_v33, %v1911_v36  ;;  %v2347_v39 = vpop.f32.mrb[54].mxu1  ;;  %v2453_v40 = vpop.f32.mrb[66].mxu0 }
 0x3f2   : > { %2008 = vst [vmem:[%s3258_s23 + $0x40] sm:$0xff] %v1920_v34  ;;  %v1923_v41 = vadd.f32 %v2453_v40, %v3381_v33  ;;  %v2348_v43 = vpop.f32.mrb[55].mxu1  ;;  %v1914_v44 = vpop.f32.mrb[67].mxu0 }
 0x3f3   : > { %v1656_v0 = vadd.f32 %v2346_v37, %v3374_v23  ;;  %2006 = vst [vmem:[%s3258_s23 + $0x10] sm:$0xff] %v1912_v38  ;;  %v2349_v42 = vadd.f32 %v2348_v43, %v2347_v39  ;;  %v1915_v45 = vadd.f32 %v3381_v33, %v1914_v44 }
 0x3f4   : > { %2009 = vst [vmem:[%s3258_s23 + $0x58] sm:$0xff] %v1923_v41 }
 0x3f5   : > { %v2214_v46 = vmul.f32 -1.442695, %v1656_v0  ;;  %v1659_v47 = vadd.f32 %v2349_v42, %v3374_v23  ;;  %2007 = vst [vmem:[%s3258_s23 + $0x28] sm:$0xff] %v1915_v45 }
 0x3f7   : > { %v2624_v48 = vpop.eup %2623  ;;  %2627 = vpow2.f32 %v2214_v46  ;;  %v2215_v51 = vmul.f32 -1.442695, %v1659_v47  ;;  %v2350_v52 = vpop.f32.mrb[56].mxu1 }
 0x3f8   : > { %v1758_v53 = vadd.f32 1.0, %v2624_v48  ;;  %v2351_v54 = vpop.f32.mrb[57].mxu1 }
 0x3f9   : > { %v2626_v55 = vpop.eup %2625  ;;  %2629 = vpow2.f32 %v2215_v51  ;;  %v2352_v56 = vadd.f32 %v2351_v54, %v2350_v52  ;;  %v2353_v57 = vpop.f32.mrb[58].mxu1 }
 0x3fa   : > { %2631 = vrcp.f32 %v1758_v53  ;;  %v1759_v58 = vadd.f32 1.0, %v2626_v55  ;;  %v2354_v59 = vpop.f32.mrb[59].mxu1 }
 0x3fb   : > { %v1664_v62 = vadd.f32 %v2352_v56, %v3374_v23  ;;  %v2355_v60 = vadd.f32 %v2354_v59, %v2353_v57 }
 0x3fc   : > { %2633 = vrcp.f32 %v1759_v58 }
 0x3fd   : > { %v2216_v1 = vmul.f32 -1.442695, %v1664_v62  ;;  %v1667_v4 = vadd.f32 %v2355_v60, %v3374_v23 }
 0x3ff   : > { %2635 = vpow2.f32 %v2216_v1  ;;  %v2217_v5 = vmul.f32 -1.442695, %v1667_v4  ;;  %v2356_v61 = vpop.f32.mrb[60].mxu1  ;;  %v2456_v6 = vpop.f32.mrb[68].mxu0 }
 0x400   : > { %v1936_v7 = vadd.f32 %v2456_v6, %v3381_v33  ;;  %v2357_v8 = vpop.f32.mrb[61].mxu1  ;;  %v1927_v9 = vpop.f32.mrb[69].mxu0 }
 0x401   : > { %v2628_v10 = vpop.eup %2627  ;;  %2637 = vpow2.f32 %v2217_v5  ;;  %v2358_v11 = vadd.f32 %v2357_v8, %v2356_v61  ;;  %v1928_v12 = vadd.f32 %v3381_v33, %v1927_v9  ;;  %v2359_v13 = vpop.f32.mrb[62].mxu1 }
 0x402   : > { %v2457_v49 = vpop.f32.mrb[70].mxu0  ;;  %v1760_v14 = vadd.f32 1.0, %v2628_v10  ;;  %2012 = vst [vmem:[%s3258_s23 + $0xa0] sm:$0xff] %v1936_v7  ;;  %v2360_v16 = vpop.f32.mrb[63].mxu1 }
 0x403   : > { %v1939_v15 = vadd.f32 %v2457_v49, %v3381_v33  ;;  %v1930_v50 = vpop.f32.mrb[71].mxu0  ;;  %v2630_v17 = vpop.eup %2629  ;;  %v1672_v63 = vadd.f32 %v2358_v11, %v3374_v23  ;;  %2010 = vst [vmem:[%s3258_s23 + $0x70] sm:$0xff] %v1928_v12  ;;  %v2361_v18 = vadd.f32 %v2360_v16, %v2359_v13 }
 0x404   : > { %v1931_v19 = vadd.f32 %v3381_v33, %v1930_v50  ;;  %v2632_v20 = vpop.eup %2631  ;;  %2639 = vrcp.f32 %v1760_v14  ;;  %v1761_v21 = vadd.f32 1.0, %v2630_v17 }
 0x405   : > { %2013 = vst [vmem:[%s3258_s23 + $0xb8] sm:$0xff] %v1939_v15  ;;  %1974 = vst [vmem:[%s3258_s23] sm:$0xff] %v2632_v20  ;;  %v2218_v22 = vmul.f32 -1.442695, %v1672_v63  ;;  %v1675_v24 = vadd.f32 %v2361_v18, %v3374_v23 }
 0x406   : > { %2011 = vst [vmem:[%s3258_s23 + $0x88] sm:$0xff] %v1931_v19  ;;  %v2634_v25 = vpop.eup %2633  ;;  %2641 = vrcp.f32 %v1761_v21 }
 0x407   : > { %1975 = vst [vmem:[%s3258_s23 + $0x18] sm:$0xff] %v2634_v25  ;;  %2643 = vpow2.f32 %v2218_v22  ;;  %v2219_v26 = vmul.f32 -1.442695, %v1675_v24  ;;  %v2362_v27 = vpop.f32.mrb[64].mxu1 }
 0x408   : > { %v2363_v28 = vpop.f32.mrb[65].mxu1 }
 0x409   : > { %v2636_v29 = vpop.eup %2635  ;;  %2645 = vpow2.f32 %v2219_v26  ;;  %v2364_v30 = vadd.f32 %v2363_v28, %v2362_v27  ;;  %v2365_v31 = vpop.f32.mrb[66].mxu1 }
 0x40a   : > { %v1762_v32 = vadd.f32 1.0, %v2636_v29  ;;  %v2366_v2 = vpop.f32.mrb[67].mxu1 }
 0x40b   : > { %v2638_v3 = vpop.eup %2637  ;;  %v1680_v34 = vadd.f32 %v2364_v30, %v3374_v23  ;;  %v2367_v35 = vadd.f32 %v2366_v2, %v2365_v31 }
 0x40c   : > { %2647 = vrcp.f32 %v1762_v32  ;;  %v1763_v36 = vadd.f32 1.0, %v2638_v3 }
 0x40d   : > { %v2220_v37 = vmul.f32 -1.442695, %v1680_v34  ;;  %v1683_v38 = vadd.f32 %v2367_v35, %v3374_v23 }
 0x40e   : > { %v2640_v39 = vpop.eup %2639  ;;  %2649 = vrcp.f32 %v1763_v36 }
 0x40f   : > { %1976 = vst [vmem:[%s3258_s23 + $0x30] sm:$0xff] %v2640_v39  ;;  %2651 = vpow2.f32 %v2220_v37  ;;  %v2221_v40 = vmul.f32 -1.442695, %v1683_v38  ;;  %v2368_v41 = vpop.f32.mrb[68].mxu1  ;;  %v2460_v43 = vpop.f32.mrb[72].mxu0 }
 0x410   : > { %v2642_v44 = vpop.eup %2641  ;;  %v1952_v0 = vadd.f32 %v2460_v43, %v3381_v33  ;;  %v2369_v42 = vpop.f32.mrb[69].mxu1 }
 0x411   : > { %v1943_v45 = vpop.f32.mrb[73].mxu0  ;;  %v2644_v46 = vpop.eup %2643  ;;  %1977 = vst [vmem:[%s3258_s23 + $0x48] sm:$0xff] %v2642_v44  ;;  %2653 = vpow2.f32 %v2221_v40  ;;  %v2370_v47 = vadd.f32 %v2369_v42, %v2368_v41 }
 0x412   : > { %v1944_v48 = vadd.f32 %v3381_v33, %v1943_v45  ;;  %v2371_v51 = vpop.f32.mrb[70].mxu1  ;;  %v2461_v52 = vpop.f32.mrb[74].mxu0  ;;  %v1764_v53 = vadd.f32 1.0, %v2644_v46  ;;  %2016 = vst [vmem:[%s3258_s23 + $0x100] sm:$0xff] %v1952_v0 }
 0x413   : > { %v1955_v54 = vadd.f32 %v2461_v52, %v3381_v33  ;;  %v2372_v55 = vpop.f32.mrb[71].mxu1  ;;  %v1946_v56 = vpop.f32.mrb[75].mxu0  ;;  %v1688_v58 = vadd.f32 %v2370_v47, %v3374_v23 }
 0x414   : > { %v2646_v57 = vpop.eup %2645  ;;  %2014 = vst [vmem:[%s3258_s23 + $0xd0] sm:$0xff] %v1944_v48  ;;  %v2373_v59 = vadd.f32 %v2372_v55, %v2371_v51  ;;  %v1947_v62 = vadd.f32 %v3381_v33, %v1946_v56  ;;  %2655 = vrcp.f32 %v1764_v53 }
 0x415   : > { %v1765_v60 = vadd.f32 1.0, %v2646_v57  ;;  %2017 = vst [vmem:[%s3258_s23 + $0x118] sm:$0xff] %v1955_v54  ;;  %v2222_v1 = vmul.f32 -1.442695, %v1688_v58 }
 0x416   : > { %v1691_v4 = vadd.f32 %v2373_v59, %v3374_v23  ;;  %2015 = vst [vmem:[%s3258_s23 + $0xe8] sm:$0xff] %v1947_v62  ;;  %v2648_v5 = vpop.eup %2647 }
 0x417   : > { %2657 = vrcp.f32 %v1765_v60  ;;  %1978 = vst [vmem:[%s3258_s23 + $0x60] sm:$0xff] %v2648_v5  ;;  %v2374_v6 = vpop.f32.mrb[72].mxu1 }
 0x418   : > { %2659 = vpow2.f32 %v2222_v1  ;;  %v2223_v61 = vmul.f32 -1.442695, %v1691_v4  ;;  %v2650_v7 = vpop.eup %2649  ;;  %v2375_v8 = vpop.f32.mrb[73].mxu1 }
 0x419   : > { %v2652_v9 = vpop.eup %2651  ;;  %1979 = vst [vmem:[%s3258_s23 + $0x78] sm:$0xff] %v2650_v7  ;;  %v2376_v10 = vadd.f32 %v2375_v8, %v2374_v6  ;;  %v2377_v11 = vpop.f32.mrb[74].mxu1 }
 0x41a   : > { %2661 = vpow2.f32 %v2223_v61  ;;  %v1766_v12 = vadd.f32 1.0, %v2652_v9  ;;  %v2378_v13 = vpop.f32.mrb[75].mxu1 }
 0x41b   : > { %v2654_v49 = vpop.eup %2653  ;;  %v1696_v14 = vadd.f32 %v2376_v10, %v3374_v23  ;;  %v2379_v15 = vadd.f32 %v2378_v13, %v2377_v11 }
 0x41c   : > { %2663 = vrcp.f32 %v1766_v12  ;;  %v1767_v16 = vadd.f32 1.0, %v2654_v49 }
 0x41d   : > { %v2224_v50 = vmul.f32 -1.442695, %v1696_v14  ;;  %v1699_v17 = vadd.f32 %v2379_v15, %v3374_v23 }
 0x41e   : > { %v2656_v63 = vpop.eup %2655  ;;  %2665 = vrcp.f32 %v1767_v16 }
 0x41f   : > { %1980 = vst [vmem:[%s3258_s23 + $0x90] sm:$0xff] %v2656_v63  ;;  %2667 = vpow2.f32 %v2224_v50  ;;  %v2225_v18 = vmul.f32 -1.442695, %v1699_v17  ;;  %v2380_v19 = vpop.f32.mrb[76].mxu1  ;;  %v2464_v20 = vpop.f32.mrb[76].mxu0 }
 0x420   : > { %v1968_v22 = vadd.f32 %v2464_v20, %v3381_v33  ;;  %v2381_v24 = vpop.f32.mrb[77].mxu1  ;;  %v1959_v25 = vpop.f32.mrb[77].mxu0 }
 0x421   : > { %v2658_v21 = vpop.eup %2657  ;;  %2669 = vpow2.f32 %v2225_v18  ;;  %v2382_v27 = vadd.f32 %v2381_v24, %v2380_v19  ;;  %v1960_v28 = vadd.f32 %v3381_v33, %v1959_v25  ;;  %v2383_v29 = vpop.f32.mrb[78].mxu1 }
 0x422   : > { %v2660_v26 = vpop.eup %2659  ;;  %1981 = vst [vmem:[%s3258_s23 + $0xa8] sm:$0xff] %v2658_v21  ;;  %v2465_v30 = vpop.f32.mrb[78].mxu0  ;;  %2020 = vst [vmem:[%s3258_s23 + $0x160] sm:$0xff] %v1968_v22 }
 0x423   : > { %v1768_v31 = vadd.f32 1.0, %v2660_v26  ;;  %v1971_v32 = vadd.f32 %v2465_v30, %v3381_v33  ;;  %v2384_v2 = vpop.f32.mrb[79].mxu1  ;;  %v1962_v3 = vpop.f32.mrb[79].mxu0  ;;  %v1704_v35 = vadd.f32 %v2382_v27, %v3374_v23  ;;  %2018 = vst [vmem:[%s3258_s23 + $0x130] sm:$0xff] %v1960_v28 }
 0x424   : > { %v2662_v34 = vpop.eup %2661  ;;  %v2385_v36 = vadd.f32 %v2384_v2, %v2383_v29  ;;  %v1963_v37 = vadd.f32 %v3381_v33, %v1962_v3 }
 0x425   : > { %2671 = vrcp.f32 %v1768_v31  ;;  %v1769_v38 = vadd.f32 1.0, %v2662_v34  ;;  %2021 = vst [vmem:[%s3258_s23 + $0x178] sm:$0xff] %v1971_v32  ;;  %v2226_v39 = vmul.f32 -1.442695, %v1704_v35 }
 0x426   : > { %v1707_v40 = vadd.f32 %v2385_v36, %v3374_v23  ;;  %2019 = vst [vmem:[%s3258_s23 + $0x148] sm:$0xff] %v1963_v37  ;;  %v2664_v41 = vpop.eup %2663 }
 0x427   : > { %2673 = vrcp.f32 %v1769_v38  ;;  %1982 = vst [vmem:[%s3258_s23 + $0xc0] sm:$0xff] %v2664_v41 }
 0x428   : > { %2675 = vpow2.f32 %v2226_v39  ;;  %v2227_v43 = vmul.f32 -1.442695, %v1707_v40  ;;  %v2666_v44 = vpop.eup %2665 }
 0x429   : > { %v2668_v0 = vpop.eup %2667  ;;  %1983 = vst [vmem:[%s3258_s23 + $0xd8] sm:$0xff] %v2666_v44 }
 0x42a   : > { %2677 = vpow2.f32 %v2227_v43  ;;  %v1770_v42 = vadd.f32 1.0, %v2668_v0 }
 0x42b   : > { %v2670_v33 = vpop.eup %2669 }
 0x42c   : > { %2679 = vrcp.f32 %v1770_v42  ;;  %v1771_v45 = vadd.f32 1.0, %v2670_v33 }
 0x42e   : > { %2681 = vrcp.f32 %v1771_v45 }
 0x42f   : > { %v2672_v23 = vpop.eup %2671 }
 0x430   : > { %1984 = vst [vmem:[%s3258_s23 + $0xf0] sm:$0xff] %v2672_v23 }
 0x431   : > { %v2674_v46 = vpop.eup %2673 }
 0x432   : > { %v2676_v47 = vpop.eup %2675  ;;  %1985 = vst [vmem:[%s3258_s23 + $0x108] sm:$0xff] %v2674_v46 }
 0x433   : > { %v1772_v48 = vadd.f32 1.0, %v2676_v47 }
 0x434   : > { %v2678_v51 = vpop.eup %2677 }
 0x435   : > { %2683 = vrcp.f32 %v1772_v48  ;;  %v1773_v52 = vadd.f32 1.0, %v2678_v51 }
 0x436   : > { %v2680_v53 = vpop.eup %2679 }
 0x437   : > { %2685 = vrcp.f32 %v1773_v52  ;;  %1986 = vst [vmem:[%s3258_s23 + $0x120] sm:$0xff] %v2680_v53 }
 0x438   : > { %v2682_v54 = vpop.eup %2681 }
 0x439   : > { %1987 = vst [vmem:[%s3258_s23 + $0x138] sm:$0xff] %v2682_v54 }
 0x43f   : > { %v2684_v55 = vpop.eup %2683 }
 0x440   : > { %1988 = vst [vmem:[%s3258_s23 + $0x150] sm:$0xff] %v2684_v55 }
 0x441   : > { %v2686_v56 = vpop.eup %2685 }
 0x442   : > { %1989 = vst [vmem:[%s3258_s23 + $0x168] sm:$0xff] %v2686_v56 }
 0x443   : > { %2784 = shalt.err (!%p2781_p11)
}
 0x444   : > { %s2785_s29 = scalar_lea.hbm %s3448_s16, 6144  ;;  %s2789_s9 = scalar_lea.hbm %s3504_s7, 12288 }
 0x445   : > { %p2786_p5 = scmp.ne.s32.totalorder %s3448_s16, %s2785_s29  ;;  %p2790_p9 = scmp.lt.u32.totalorder %s3448_s16, %s3504_s7 }
 0x446   : > { %p2791_p10 = scmp.lt.u32.totalorder %s2789_s9, %s2785_s29  ;;  %p2793_p13 = scmp.lt.u32.totalorder %s2785_s29, %s3448_s16 }
 0x447   : > { %p2787_p0 = pnand %p2786_p5, %p3527_p1 }
 0x448   : > { %p2792_p12 = por %p2791_p10, %p2790_p9 }
 0x449   : > { %p2788_p6 = pneg %p2787_p0 }
 0x44a   : > { %p2794_p2 = por %p2793_p13, %p2792_p12 }
 0x44c   : > { %p2795_p3 = pnand %p2794_p2, %p2788_p6 }
 0x44e   : > { %2798 = shalt.err (!%p2795_p3)
}
 0x44f   : > { %s2852_s18 = smov 384   ;;  %s2853_s17 = smov 24  }
 0x450   : > { %2480 = dma.vmem_to_hbm [thread:$0]  (%p3527_p1), %s3450_s10, 6144, %s3448_s16, %s3456_s13, %s2852_s18, %s2852_s18, %s2853_s17  }
 0x451 PF: > { %p2502_p4 = scmp.ge.s32.totalorder %s2841_s27, 2  ;;  %s2052_s20 = sand.u32 1, %s2829_s24  }
 0x452   : > { %p3528_p7 = scmp.ne.s32.totalorder %s3515_s12, 0  ;;  %s2053_s4 = scalar_lea.sflag [#allocation4], %s2052_s20 }
 0x454   : > { %p2493_p8 = pnand %p2502_p4, %p3528_p7 }
 0x456   : > { %2824 = dma.done.wait (!%p2493_p8), %s2053_s4, 6144  }
 0x457   : > { %2826 = vsyncadd (!%p2493_p8), %s2053_s4, 4294961152  ;;  %s3529_s19 = sld [smem:[#allocation12_spill]]  ;;  %s3530_s26 = sld [smem:[#allocation13_spill]] }
 0x458   : > { %p19_p11 = scmp.ge.s32.totalorder %s2919_s30, 4   ;;  %s3531_s24 = smov %s2833_s25 }
 0x459   : > { %s3533_s27 = smov %s2919_s30 }
 0x45a   :  { %21 = sbr.rel (!%p19_p11) target bundleno = 7 (0x7), region = 96 }
 0x45d   : > { %s3532_s25 = smov %s3529_s19 }
 0x461   :  { %2058 = vsyncpa [#allocation3], 1 }
 0x462   :  { %2060 = vsyncpa [#allocation3 + $0x1], 1 }
 0x463   :  { %2061 = vsyncpa [#allocation6], 1 }
 0x464   :  { %2062 = vsyncpa [#allocation4], 1 }
 0x465   :  { %2064 = vsyncpa [#allocation4 + $0x1], 1 }

</bundles_post_ra>
